<compile_context>
chip_gen: v6e
topology: v6e:2x2x1
jax: 0.10.0
libtpu: 0.0.40
codegen_flags: <defaults>
</compile_context>

<pallas_src>
import jax
import jax.numpy as jnp
from jax import lax
from jax.experimental import pallas as pl
from jax.experimental.pallas import tpu as pltpu


def _round_up(n, m):
    return ((n + m - 1) // m) * m


def _make_fused_rnn_kernel(seq_len, batch_p):
    """Kernel closed over the static sequence length / padded batch size."""

    def kernel(x_ref, wih_ref, whh_ref, bias_ref, wout_ref, bout_ref,
               y_ref, h_ref):
        # x_ref   : (S*Bp, 1)   f32   inputs, flattened over (time, batch)
        # wih_ref : (1, Hp)     f32   W_ih row (input_size == 1), zero-padded
        # whh_ref : (Hp, Hp)    bf16  W_hh^T, zero-padded rows+cols
        # bias_ref: (1, Hp)     f32   b_ih + b_hh, zero-padded
        # wout_ref: (1, Hp)     f32   W_out row (output_size == 1), zero-padded
        # bout_ref: (1, Op)     f32   b_out, zero-padded
        # y_ref   : (S*Bp, Op)  f32   padded output, written once at the end
        # h_ref   : (S*Bp, Hp)  f32   scratch: input projections, then h_t
        hp = whh_ref.shape[0]

        # Hoisted input projection + combined bias for every timestep at once:
        # pure VPU broadcast outer product, MXU not involved.
        h_ref[...] = x_ref[...] * wih_ref[...] + bias_ref[...]

        # Sequential recurrence, fully unrolled (seq_len is small & static).
        # Per step: one (Bp,Hp)x(Hp,Hp) bf16 MXU matmul with f32 accumulation,
        # then f32 add + tanh (VPU/EUP).  Padded hidden lanes stay exactly 0.
        h = jnp.zeros((batch_p, hp), dtype=jnp.float32)
        for t in range(seq_len):
            rows = pl.ds(t * batch_p, batch_p)          # (8,128)-aligned slab
            h = jnp.tanh(
                h_ref[rows, :]
                + jnp.dot(h.astype(jnp.bfloat16), whh_ref[...],
                          preferred_element_type=jnp.float32))
            h_ref[rows, :] = h

        # O=1 output head: VPU multiply + lane reduction (XLU), broadcast into
        # the lane-dense Op-wide slab (only column 0 is meaningful; the rest is
        # sliced off outside).  Avoids a second MXU weight load.
        yv = jnp.sum(h_ref[...] * wout_ref[...], axis=-1, keepdims=True)
        y_ref[...] = yv + bout_ref[...]

    return kernel


def simple_rnn_forward(x, params):
    """x: (S, B, 1) float32 -> (S, B, 1) float32. `params` in PyTorch layout."""
    S, B, I = x.shape
    w_ih, w_hh, b_ih, b_hh, w_out, b_out = params
    H = w_hh.shape[0]
    O = w_out.shape[0]
    assert I == 1 and O == 1, "kernel is specialized for input_size=output_size=1"

    Hp = _round_up(H, 128)      # hidden  -> lane width
    Bp = _round_up(B, 8)        # batch   -> sublane width
    Op = 128                    # output  -> lane-dense store
    f32 = jnp.float32

    # Zero-padded operands (kernel does row-major broadcasts / x @ W^T).
    wih_p = jnp.zeros((1, Hp), f32).at[0, :H].set(w_ih[:, 0])
    whh_p = (jnp.zeros((Hp, Hp), f32).at[:H, :H].set(w_hh.T)
             .astype(jnp.bfloat16))                     # single-pass MXU input
    bias_p = jnp.zeros((1, Hp), f32).at[0, :H].set(b_ih + b_hh)
    wout_p = jnp.zeros((1, Hp), f32).at[0, :H].set(w_out[0, :])
    bout_p = jnp.zeros((1, Op), f32).at[0, :O].set(b_out)

    # Pad batch with zero rows (independent, discarded) and flatten
    # (S, Bp, 1) -> (S*Bp, 1): each timestep is a tile-aligned slab of rows.
    x_pad = jnp.zeros((S, Bp, I), f32).at[:, :B, :].set(x)
    x2 = x_pad.reshape(S * Bp, I)

    kernel = _make_fused_rnn_kernel(S, Bp)
    vmem_spec = pl.BlockSpec(memory_space=pltpu.MemorySpace.VMEM)

    # Single invocation, no grid: every operand is resident in VMEM exactly
    # once (no double-buffering).  Total footprint well under 1 MiB.
    # TODO(synk): for long sequences, chunk S over a grid axis (carry h in a
    # small VMEM scratch) instead of keeping the whole history resident.
    y_pad = pl.pallas_call(
        kernel,
        out_shape=jax.ShapeDtypeStruct((S * Bp, Op), f32),
        in_specs=[vmem_spec] * 6,
        out_specs=vmem_spec,
        scratch_shapes=[pltpu.VMEM((S * Bp, Hp), f32)],   # hidden history
    )(x2, wih_p, whh_p, bias_p, wout_p, bout_p)

    # Strip batch / output padding outside the kernel.
    return y_pad.reshape(S, Bp, Op)[:, :B, :O]


def init_params(key, input_size, hidden_size, output_size):
    """Deterministic init mimicking PyTorch's U(-1/sqrt(H), 1/sqrt(H))."""
    ks = jax.random.split(key, 6)
    bound = 1.0 / jnp.sqrt(jnp.float32(hidden_size))
    u = lambda k, shape: jax.random.uniform(
        k, shape, dtype=jnp.float32, minval=-bound, maxval=bound)
    w_ih = u(ks[0], (hidden_size, input_size))    # PyTorch weight_ih_l0
    w_hh = u(ks[1], (hidden_size, hidden_size))   # PyTorch weight_hh_l0
    b_ih = u(ks[2], (hidden_size,))
    b_hh = u(ks[3], (hidden_size,))
    w_out = u(ks[4], (output_size, hidden_size))  # Linear weight
    b_out = u(ks[5], (output_size,))
    return (w_ih, w_hh, b_ih, b_hh, w_out, b_out)


def simple_rnn_reference(x, params):
    """Pure-JAX f32 reference (lax.scan) matching PyTorch nn.RNN + nn.Linear."""
    w_ih, w_hh, b_ih, b_hh, w_out, b_out = params
    S, B, I = x.shape
    H = w_hh.shape[0]

    def step(h, x_t):
        h_new = jnp.tanh(x_t @ w_ih.T + h @ w_hh.T + b_ih + b_hh)
        y_t = h_new @ w_out.T + b_out
        return h_new, y_t

    h0 = jnp.zeros((B, H), jnp.float32)
    _, y = lax.scan(step, h0, x)
    return y


if __name__ == "__main__":
    input_size, hidden_size, output_size = 1, 100, 1
    seq_len, batch = 16, 4

    key = jax.random.PRNGKey(0)
    kx, kp = jax.random.split(key)

    # Small deterministic input, shape (seq_len, batch, input_size).
    x = jax.random.normal(kx, (seq_len, batch, input_size), dtype=jnp.float32)
    params = init_params(kp, input_size, hidden_size, output_size)

    y = simple_rnn_forward(x, params)
    y = jax.block_until_ready(y)

    y_ref = simple_rnn_reference(x, params)
    assert y.shape == (seq_len, batch, output_size)
    # Tolerance relaxed vs. the f32 reference because the recurrence matmul
    # runs with bf16 inputs (f32 accumulation) — documented precision trade.
    err = float(jnp.max(jnp.abs(y - y_ref)))
    assert err < 2e-2, err

    print("KERNEL_OK")
</pallas_src>

<mosaic_0001>
module attributes {stable_mosaic.version = 11 : i64} {
  func.func @kernel(%arg0: memref<128x1xf32, #tpu.memory_space<vmem>>, %arg1: memref<1x128xf32, #tpu.memory_space<vmem>>, %arg2: memref<128x128xbf16, #tpu.memory_space<vmem>>, %arg3: memref<1x128xf32, #tpu.memory_space<vmem>>, %arg4: memref<1x128xf32, #tpu.memory_space<vmem>>, %arg5: memref<1x128xf32, #tpu.memory_space<vmem>>, %arg6: memref<128x128xf32, #tpu.memory_space<vmem>>, %arg7: memref<128x128xf32, #tpu.memory_space<vmem>>) attributes {dimension_semantics = [], scalar_prefetch = 0 : i64, scratch_operands = 1 : i64, tpu.core_type = #tpu.core_type<tc>} {
    %c0 = arith.constant 0 : index
    %c0_0 = arith.constant 0 : index
    %0 = vector.load %arg0[%c0, %c0_0] : memref<128x1xf32, #tpu.memory_space<vmem>>, vector<128x1xf32>
    %c0_1 = arith.constant 0 : index
    %c0_2 = arith.constant 0 : index
    %1 = vector.load %arg1[%c0_1, %c0_2] : memref<1x128xf32, #tpu.memory_space<vmem>>, vector<1x128xf32>
    %2 = vector.broadcast %0 : vector<128x1xf32> to vector<128x128xf32>
    %3 = vector.broadcast %1 : vector<1x128xf32> to vector<128x128xf32>
    %4 = arith.mulf %2, %3 : vector<128x128xf32>
    %c0_3 = arith.constant 0 : index
    %c0_4 = arith.constant 0 : index
    %5 = vector.load %arg3[%c0_3, %c0_4] : memref<1x128xf32, #tpu.memory_space<vmem>>, vector<1x128xf32>
    %6 = vector.broadcast %5 : vector<1x128xf32> to vector<128x128xf32>
    %7 = arith.addf %4, %6 : vector<128x128xf32>
    %c0_5 = arith.constant 0 : index
    %c0_6 = arith.constant 0 : index
    %8 = vector.load %arg7[%c0_5, %c0_6] : memref<128x128xf32, #tpu.memory_space<vmem>>, vector<128x128xf32>
    tpu.vector_store %arg7[%c0_5, %c0_6], %7 {strides = array<i32>} : memref<128x128xf32, #tpu.memory_space<vmem>>, vector<128x128xf32>,
    %cst = arith.constant 0.000000e+00 : f32
    %9 = vector.broadcast %cst : f32 to vector<8x128xf32>
    %c0_7 = arith.constant 0 : index
    %c0_8 = arith.constant 0 : index
    %10 = vector.load %arg7[%c0_7, %c0_8] : memref<128x128xf32, #tpu.memory_space<vmem>>, vector<8x128xf32>
    %11 = arith.truncf %9 : vector<8x128xf32> to vector<8x128xbf16>
    %c0_9 = arith.constant 0 : index
    %c0_10 = arith.constant 0 : index
    %12 = vector.load %arg2[%c0_9, %c0_10] : memref<128x128xbf16, #tpu.memory_space<vmem>>, vector<128x128xbf16>
    %cst_11 = arith.constant dense<0.000000e+00> : vector<8x128xf32>
    %13 = tpu.matmul %11, %12, %cst_11 {dimension_numbers = #tpu.dot_dimension_numbers<[1], [0], [0], [1], [0, 0, 1, 1], [], []>} : vector<8x128xbf16>, vector<128x128xbf16>, vector<8x128xf32> -> vector<8x128xf32>
    %14 = arith.addf %10, %13 : vector<8x128xf32>
    %15 = math.tanh %14 : vector<8x128xf32>
    %c0_12 = arith.constant 0 : index
    %c0_13 = arith.constant 0 : index
    %16 = vector.load %arg7[%c0_12, %c0_13] : memref<128x128xf32, #tpu.memory_space<vmem>>, vector<8x128xf32>
    tpu.vector_store %arg7[%c0_12, %c0_13], %15 {strides = array<i32>} : memref<128x128xf32, #tpu.memory_space<vmem>>, vector<8x128xf32>,
    %c8 = arith.constant 8 : index
    %c0_14 = arith.constant 0 : index
    %17 = vector.load %arg7[%c8, %c0_14] : memref<128x128xf32, #tpu.memory_space<vmem>>, vector<8x128xf32>
    %18 = arith.truncf %15 : vector<8x128xf32> to vector<8x128xbf16>
    %c0_15 = arith.constant 0 : index
    %c0_16 = arith.constant 0 : index
    %19 = vector.load %arg2[%c0_15, %c0_16] : memref<128x128xbf16, #tpu.memory_space<vmem>>, vector<128x128xbf16>
    %cst_17 = arith.constant dense<0.000000e+00> : vector<8x128xf32>
    %20 = tpu.matmul %18, %19, %cst_17 {dimension_numbers = #tpu.dot_dimension_numbers<[1], [0], [0], [1], [0, 0, 1, 1], [], []>} : vector<8x128xbf16>, vector<128x128xbf16>, vector<8x128xf32> -> vector<8x128xf32>
    %21 = arith.addf %17, %20 : vector<8x128xf32>
    %22 = math.tanh %21 : vector<8x128xf32>
    %c8_18 = arith.constant 8 : index
    %c0_19 = arith.constant 0 : index
    %23 = vector.load %arg7[%c8_18, %c0_19] : memref<128x128xf32, #tpu.memory_space<vmem>>, vector<8x128xf32>
    tpu.vector_store %arg7[%c8_18, %c0_19], %22 {strides = array<i32>} : memref<128x128xf32, #tpu.memory_space<vmem>>, vector<8x128xf32>,
    %c16 = arith.constant 16 : index
    %c0_20 = arith.constant 0 : index
    %24 = vector.load %arg7[%c16, %c0_20] : memref<128x128xf32, #tpu.memory_space<vmem>>, vector<8x128xf32>
    %25 = arith.truncf %22 : vector<8x128xf32> to vector<8x128xbf16>
    %c0_21 = arith.constant 0 : index
    %c0_22 = arith.constant 0 : index
    %26 = vector.load %arg2[%c0_21, %c0_22] : memref<128x128xbf16, #tpu.memory_space<vmem>>, vector<128x128xbf16>
    %cst_23 = arith.constant dense<0.000000e+00> : vector<8x128xf32>
    %27 = tpu.matmul %25, %26, %cst_23 {dimension_numbers = #tpu.dot_dimension_numbers<[1], [0], [0], [1], [0, 0, 1, 1], [], []>} : vector<8x128xbf16>, vector<128x128xbf16>, vector<8x128xf32> -> vector<8x128xf32>
    %28 = arith.addf %24, %27 : vector<8x128xf32>
    %29 = math.tanh %28 : vector<8x128xf32>
    %c16_24 = arith.constant 16 : index
    %c0_25 = arith.constant 0 : index
    %30 = vector.load %arg7[%c16_24, %c0_25] : memref<128x128xf32, #tpu.memory_space<vmem>>, vector<8x128xf32>
    tpu.vector_store %arg7[%c16_24, %c0_25], %29 {strides = array<i32>} : memref<128x128xf32, #tpu.memory_space<vmem>>, vector<8x128xf32>,
    %c24 = arith.constant 24 : index
    %c0_26 = arith.constant 0 : index
    %31 = vector.load %arg7[%c24, %c0_26] : memref<128x128xf32, #tpu.memory_space<vmem>>, vector<8x128xf32>
    %32 = arith.truncf %29 : vector<8x128xf32> to vector<8x128xbf16>
    %c0_27 = arith.constant 0 : index
    %c0_28 = arith.constant 0 : index
    %33 = vector.load %arg2[%c0_27, %c0_28] : memref<128x128xbf16, #tpu.memory_space<vmem>>, vector<128x128xbf16>
    %cst_29 = arith.constant dense<0.000000e+00> : vector<8x128xf32>
    %34 = tpu.matmul %32, %33, %cst_29 {dimension_numbers = #tpu.dot_dimension_numbers<[1], [0], [0], [1], [0, 0, 1, 1], [], []>} : vector<8x128xbf16>, vector<128x128xbf16>, vector<8x128xf32> -> vector<8x128xf32>
    %35 = arith.addf %31, %34 : vector<8x128xf32>
    %36 = math.tanh %35 : vector<8x128xf32>
    %c24_30 = arith.constant 24 : index
    %c0_31 = arith.constant 0 : index
    %37 = vector.load %arg7[%c24_30, %c0_31] : memref<128x128xf32, #tpu.memory_space<vmem>>, vector<8x128xf32>
    tpu.vector_store %arg7[%c24_30, %c0_31], %36 {strides = array<i32>} : memref<128x128xf32, #tpu.memory_space<vmem>>, vector<8x128xf32>,
    %c32 = arith.constant 32 : index
    %c0_32 = arith.constant 0 : index
    %38 = vector.load %arg7[%c32, %c0_32] : memref<128x128xf32, #tpu.memory_space<vmem>>, vector<8x128xf32>
    %39 = arith.truncf %36 : vector<8x128xf32> to vector<8x128xbf16>
    %c0_33 = arith.constant 0 : index
    %c0_34 = arith.constant 0 : index
    %40 = vector.load %arg2[%c0_33, %c0_34] : memref<128x128xbf16, #tpu.memory_space<vmem>>, vector<128x128xbf16>
    %cst_35 = arith.constant dense<0.000000e+00> : vector<8x128xf32>
    %41 = tpu.matmul %39, %40, %cst_35 {dimension_numbers = #tpu.dot_dimension_numbers<[1], [0], [0], [1], [0, 0, 1, 1], [], []>} : vector<8x128xbf16>, vector<128x128xbf16>, vector<8x128xf32> -> vector<8x128xf32>
    %42 = arith.addf %38, %41 : vector<8x128xf32>
    %43 = math.tanh %42 : vector<8x128xf32>
    %c32_36 = arith.constant 32 : index
    %c0_37 = arith.constant 0 : index
    %44 = vector.load %arg7[%c32_36, %c0_37] : memref<128x128xf32, #tpu.memory_space<vmem>>, vector<8x128xf32>
    tpu.vector_store %arg7[%c32_36, %c0_37], %43 {strides = array<i32>} : memref<128x128xf32, #tpu.memory_space<vmem>>, vector<8x128xf32>,
    %c40 = arith.constant 40 : index
    %c0_38 = arith.constant 0 : index
    %45 = vector.load %arg7[%c40, %c0_38] : memref<128x128xf32, #tpu.memory_space<vmem>>, vector<8x128xf32>
    %46 = arith.truncf %43 : vector<8x128xf32> to vector<8x128xbf16>
    %c0_39 = arith.constant 0 : index
    %c0_40 = arith.constant 0 : index
    %47 = vector.load %arg2[%c0_39, %c0_40] : memref<128x128xbf16, #tpu.memory_space<vmem>>, vector<128x128xbf16>
    %cst_41 = arith.constant dense<0.000000e+00> : vector<8x128xf32>
    %48 = tpu.matmul %46, %47, %cst_41 {dimension_numbers = #tpu.dot_dimension_numbers<[1], [0], [0], [1], [0, 0, 1, 1], [], []>} : vector<8x128xbf16>, vector<128x128xbf16>, vector<8x128xf32> -> vector<8x128xf32>
    %49 = arith.addf %45, %48 : vector<8x128xf32>
    %50 = math.tanh %49 : vector<8x128xf32>
    %c40_42 = arith.constant 40 : index
    %c0_43 = arith.constant 0 : index
    %51 = vector.load %arg7[%c40_42, %c0_43] : memref<128x128xf32, #tpu.memory_space<vmem>>, vector<8x128xf32>
    tpu.vector_store %arg7[%c40_42, %c0_43], %50 {strides = array<i32>} : memref<128x128xf32, #tpu.memory_space<vmem>>, vector<8x128xf32>,
    %c48 = arith.constant 48 : index
    %c0_44 = arith.constant 0 : index
    %52 = vector.load %arg7[%c48, %c0_44] : memref<128x128xf32, #tpu.memory_space<vmem>>, vector<8x128xf32>
    %53 = arith.truncf %50 : vector<8x128xf32> to vector<8x128xbf16>
    %c0_45 = arith.constant 0 : index
    %c0_46 = arith.constant 0 : index
    %54 = vector.load %arg2[%c0_45, %c0_46] : memref<128x128xbf16, #tpu.memory_space<vmem>>, vector<128x128xbf16>
    %cst_47 = arith.constant dense<0.000000e+00> : vector<8x128xf32>
    %55 = tpu.matmul %53, %54, %cst_47 {dimension_numbers = #tpu.dot_dimension_numbers<[1], [0], [0], [1], [0, 0, 1, 1], [], []>} : vector<8x128xbf16>, vector<128x128xbf16>, vector<8x128xf32> -> vector<8x128xf32>
    %56 = arith.addf %52, %55 : vector<8x128xf32>
    %57 = math.tanh %56 : vector<8x128xf32>
    %c48_48 = arith.constant 48 : index
    %c0_49 = arith.constant 0 : index
    %58 = vector.load %arg7[%c48_48, %c0_49] : memref<128x128xf32, #tpu.memory_space<vmem>>, vector<8x128xf32>
    tpu.vector_store %arg7[%c48_48, %c0_49], %57 {strides = array<i32>} : memref<128x128xf32, #tpu.memory_space<vmem>>, vector<8x128xf32>,
    %c56 = arith.constant 56 : index
    %c0_50 = arith.constant 0 : index
    %59 = vector.load %arg7[%c56, %c0_50] : memref<128x128xf32, #tpu.memory_space<vmem>>, vector<8x128xf32>
    %60 = arith.truncf %57 : vector<8x128xf32> to vector<8x128xbf16>
    %c0_51 = arith.constant 0 : index
    %c0_52 = arith.constant 0 : index
    %61 = vector.load %arg2[%c0_51, %c0_52] : memref<128x128xbf16, #tpu.memory_space<vmem>>, vector<128x128xbf16>
    %cst_53 = arith.constant dense<0.000000e+00> : vector<8x128xf32>
    %62 = tpu.matmul %60, %61, %cst_53 {dimension_numbers = #tpu.dot_dimension_numbers<[1], [0], [0], [1], [0, 0, 1, 1], [], []>} : vector<8x128xbf16>, vector<128x128xbf16>, vector<8x128xf32> -> vector<8x128xf32>
    %63 = arith.addf %59, %62 : vector<8x128xf32>
    %64 = math.tanh %63 : vector<8x128xf32>
    %c56_54 = arith.constant 56 : index
    %c0_55 = arith.constant 0 : index
    %65 = vector.load %arg7[%c56_54, %c0_55] : memref<128x128xf32, #tpu.memory_space<vmem>>, vector<8x128xf32>
    tpu.vector_store %arg7[%c56_54, %c0_55], %64 {strides = array<i32>} : memref<128x128xf32, #tpu.memory_space<vmem>>, vector<8x128xf32>,
    %c64 = arith.constant 64 : index
    %c0_56 = arith.constant 0 : index
    %66 = vector.load %arg7[%c64, %c0_56] : memref<128x128xf32, #tpu.memory_space<vmem>>, vector<8x128xf32>
    %67 = arith.truncf %64 : vector<8x128xf32> to vector<8x128xbf16>
    %c0_57 = arith.constant 0 : index
    %c0_58 = arith.constant 0 : index
    %68 = vector.load %arg2[%c0_57, %c0_58] : memref<128x128xbf16, #tpu.memory_space<vmem>>, vector<128x128xbf16>
    %cst_59 = arith.constant dense<0.000000e+00> : vector<8x128xf32>
    %69 = tpu.matmul %67, %68, %cst_59 {dimension_numbers = #tpu.dot_dimension_numbers<[1], [0], [0], [1], [0, 0, 1, 1], [], []>} : vector<8x128xbf16>, vector<128x128xbf16>, vector<8x128xf32> -> vector<8x128xf32>
    %70 = arith.addf %66, %69 : vector<8x128xf32>
    %71 = math.tanh %70 : vector<8x128xf32>
    %c64_60 = arith.constant 64 : index
    %c0_61 = arith.constant 0 : index
    %72 = vector.load %arg7[%c64_60, %c0_61] : memref<128x128xf32, #tpu.memory_space<vmem>>, vector<8x128xf32>
    tpu.vector_store %arg7[%c64_60, %c0_61], %71 {strides = array<i32>} : memref<128x128xf32, #tpu.memory_space<vmem>>, vector<8x128xf32>,
    %c72 = arith.constant 72 : index
    %c0_62 = arith.constant 0 : index
    %73 = vector.load %arg7[%c72, %c0_62] : memref<128x128xf32, #tpu.memory_space<vmem>>, vector<8x128xf32>
    %74 = arith.truncf %71 : vector<8x128xf32> to vector<8x128xbf16>
    %c0_63 = arith.constant 0 : index
    %c0_64 = arith.constant 0 : index
    %75 = vector.load %arg2[%c0_63, %c0_64] : memref<128x128xbf16, #tpu.memory_space<vmem>>, vector<128x128xbf16>
    %cst_65 = arith.constant dense<0.000000e+00> : vector<8x128xf32>
    %76 = tpu.matmul %74, %75, %cst_65 {dimension_numbers = #tpu.dot_dimension_numbers<[1], [0], [0], [1], [0, 0, 1, 1], [], []>} : vector<8x128xbf16>, vector<128x128xbf16>, vector<8x128xf32> -> vector<8x128xf32>
    %77 = arith.addf %73, %76 : vector<8x128xf32>
    %78 = math.tanh %77 : vector<8x128xf32>
    %c72_66 = arith.constant 72 : index
    %c0_67 = arith.constant 0 : index
    %79 = vector.load %arg7[%c72_66, %c0_67] : memref<128x128xf32, #tpu.memory_space<vmem>>, vector<8x128xf32>
    tpu.vector_store %arg7[%c72_66, %c0_67], %78 {strides = array<i32>} : memref<128x128xf32, #tpu.memory_space<vmem>>, vector<8x128xf32>,
    %c80 = arith.constant 80 : index
    %c0_68 = arith.constant 0 : index
    %80 = vector.load %arg7[%c80, %c0_68] : memref<128x128xf32, #tpu.memory_space<vmem>>, vector<8x128xf32>
    %81 = arith.truncf %78 : vector<8x128xf32> to vector<8x128xbf16>
    %c0_69 = arith.constant 0 : index
    %c0_70 = arith.constant 0 : index
    %82 = vector.load %arg2[%c0_69, %c0_70] : memref<128x128xbf16, #tpu.memory_space<vmem>>, vector<128x128xbf16>
    %cst_71 = arith.constant dense<0.000000e+00> : vector<8x128xf32>
    %83 = tpu.matmul %81, %82, %cst_71 {dimension_numbers = #tpu.dot_dimension_numbers<[1], [0], [0], [1], [0, 0, 1, 1], [], []>} : vector<8x128xbf16>, vector<128x128xbf16>, vector<8x128xf32> -> vector<8x128xf32>
    %84 = arith.addf %80, %83 : vector<8x128xf32>
    %85 = math.tanh %84 : vector<8x128xf32>
    %c80_72 = arith.constant 80 : index
    %c0_73 = arith.constant 0 : index
    %86 = vector.load %arg7[%c80_72, %c0_73] : memref<128x128xf32, #tpu.memory_space<vmem>>, vector<8x128xf32>
    tpu.vector_store %arg7[%c80_72, %c0_73], %85 {strides = array<i32>} : memref<128x128xf32, #tpu.memory_space<vmem>>, vector<8x128xf32>,
    %c88 = arith.constant 88 : index
    %c0_74 = arith.constant 0 : index
    %87 = vector.load %arg7[%c88, %c0_74] : memref<128x128xf32, #tpu.memory_space<vmem>>, vector<8x128xf32>
    %88 = arith.truncf %85 : vector<8x128xf32> to vector<8x128xbf16>
    %c0_75 = arith.constant 0 : index
    %c0_76 = arith.constant 0 : index
    %89 = vector.load %arg2[%c0_75, %c0_76] : memref<128x128xbf16, #tpu.memory_space<vmem>>, vector<128x128xbf16>
    %cst_77 = arith.constant dense<0.000000e+00> : vector<8x128xf32>
    %90 = tpu.matmul %88, %89, %cst_77 {dimension_numbers = #tpu.dot_dimension_numbers<[1], [0], [0], [1], [0, 0, 1, 1], [], []>} : vector<8x128xbf16>, vector<128x128xbf16>, vector<8x128xf32> -> vector<8x128xf32>
    %91 = arith.addf %87, %90 : vector<8x128xf32>
    %92 = math.tanh %91 : vector<8x128xf32>
    %c88_78 = arith.constant 88 : index
    %c0_79 = arith.constant 0 : index
    %93 = vector.load %arg7[%c88_78, %c0_79] : memref<128x128xf32, #tpu.memory_space<vmem>>, vector<8x128xf32>
    tpu.vector_store %arg7[%c88_78, %c0_79], %92 {strides = array<i32>} : memref<128x128xf32, #tpu.memory_space<vmem>>, vector<8x128xf32>,
    %c96 = arith.constant 96 : index
    %c0_80 = arith.constant 0 : index
    %94 = vector.load %arg7[%c96, %c0_80] : memref<128x128xf32, #tpu.memory_space<vmem>>, vector<8x128xf32>
    %95 = arith.truncf %92 : vector<8x128xf32> to vector<8x128xbf16>
    %c0_81 = arith.constant 0 : index
    %c0_82 = arith.constant 0 : index
    %96 = vector.load %arg2[%c0_81, %c0_82] : memref<128x128xbf16, #tpu.memory_space<vmem>>, vector<128x128xbf16>
    %cst_83 = arith.constant dense<0.000000e+00> : vector<8x128xf32>
    %97 = tpu.matmul %95, %96, %cst_83 {dimension_numbers = #tpu.dot_dimension_numbers<[1], [0], [0], [1], [0, 0, 1, 1], [], []>} : vector<8x128xbf16>, vector<128x128xbf16>, vector<8x128xf32> -> vector<8x128xf32>
    %98 = arith.addf %94, %97 : vector<8x128xf32>
    %99 = math.tanh %98 : vector<8x128xf32>
    %c96_84 = arith.constant 96 : index
    %c0_85 = arith.constant 0 : index
    %100 = vector.load %arg7[%c96_84, %c0_85] : memref<128x128xf32, #tpu.memory_space<vmem>>, vector<8x128xf32>
    tpu.vector_store %arg7[%c96_84, %c0_85], %99 {strides = array<i32>} : memref<128x128xf32, #tpu.memory_space<vmem>>, vector<8x128xf32>,
    %c104 = arith.constant 104 : index
    %c0_86 = arith.constant 0 : index
    %101 = vector.load %arg7[%c104, %c0_86] : memref<128x128xf32, #tpu.memory_space<vmem>>, vector<8x128xf32>
    %102 = arith.truncf %99 : vector<8x128xf32> to vector<8x128xbf16>
    %c0_87 = arith.constant 0 : index
    %c0_88 = arith.constant 0 : index
    %103 = vector.load %arg2[%c0_87, %c0_88] : memref<128x128xbf16, #tpu.memory_space<vmem>>, vector<128x128xbf16>
    %cst_89 = arith.constant dense<0.000000e+00> : vector<8x128xf32>
    %104 = tpu.matmul %102, %103, %cst_89 {dimension_numbers = #tpu.dot_dimension_numbers<[1], [0], [0], [1], [0, 0, 1, 1], [], []>} : vector<8x128xbf16>, vector<128x128xbf16>, vector<8x128xf32> -> vector<8x128xf32>
    %105 = arith.addf %101, %104 : vector<8x128xf32>
    %106 = math.tanh %105 : vector<8x128xf32>
    %c104_90 = arith.constant 104 : index
    %c0_91 = arith.constant 0 : index
    %107 = vector.load %arg7[%c104_90, %c0_91] : memref<128x128xf32, #tpu.memory_space<vmem>>, vector<8x128xf32>
    tpu.vector_store %arg7[%c104_90, %c0_91], %106 {strides = array<i32>} : memref<128x128xf32, #tpu.memory_space<vmem>>, vector<8x128xf32>,
    %c112 = arith.constant 112 : index
    %c0_92 = arith.constant 0 : index
    %108 = vector.load %arg7[%c112, %c0_92] : memref<128x128xf32, #tpu.memory_space<vmem>>, vector<8x128xf32>
    %109 = arith.truncf %106 : vector<8x128xf32> to vector<8x128xbf16>
    %c0_93 = arith.constant 0 : index
    %c0_94 = arith.constant 0 : index
    %110 = vector.load %arg2[%c0_93, %c0_94] : memref<128x128xbf16, #tpu.memory_space<vmem>>, vector<128x128xbf16>
    %cst_95 = arith.constant dense<0.000000e+00> : vector<8x128xf32>
    %111 = tpu.matmul %109, %110, %cst_95 {dimension_numbers = #tpu.dot_dimension_numbers<[1], [0], [0], [1], [0, 0, 1, 1], [], []>} : vector<8x128xbf16>, vector<128x128xbf16>, vector<8x128xf32> -> vector<8x128xf32>
    %112 = arith.addf %108, %111 : vector<8x128xf32>
    %113 = math.tanh %112 : vector<8x128xf32>
    %c112_96 = arith.constant 112 : index
    %c0_97 = arith.constant 0 : index
    %114 = vector.load %arg7[%c112_96, %c0_97] : memref<128x128xf32, #tpu.memory_space<vmem>>, vector<8x128xf32>
    tpu.vector_store %arg7[%c112_96, %c0_97], %113 {strides = array<i32>} : memref<128x128xf32, #tpu.memory_space<vmem>>, vector<8x128xf32>,
    %c120 = arith.constant 120 : index
    %c0_98 = arith.constant 0 : index
    %115 = vector.load %arg7[%c120, %c0_98] : memref<128x128xf32, #tpu.memory_space<vmem>>, vector<8x128xf32>
    %116 = arith.truncf %113 : vector<8x128xf32> to vector<8x128xbf16>
    %c0_99 = arith.constant 0 : index
    %c0_100 = arith.constant 0 : index
    %117 = vector.load %arg2[%c0_99, %c0_100] : memref<128x128xbf16, #tpu.memory_space<vmem>>, vector<128x128xbf16>
    %cst_101 = arith.constant dense<0.000000e+00> : vector<8x128xf32>
    %118 = tpu.matmul %116, %117, %cst_101 {dimension_numbers = #tpu.dot_dimension_numbers<[1], [0], [0], [1], [0, 0, 1, 1], [], []>} : vector<8x128xbf16>, vector<128x128xbf16>, vector<8x128xf32> -> vector<8x128xf32>
    %119 = arith.addf %115, %118 : vector<8x128xf32>
    %120 = math.tanh %119 : vector<8x128xf32>
    %c120_102 = arith.constant 120 : index
    %c0_103 = arith.constant 0 : index
    %121 = vector.load %arg7[%c120_102, %c0_103] : memref<128x128xf32, #tpu.memory_space<vmem>>, vector<8x128xf32>
    tpu.vector_store %arg7[%c120_102, %c0_103], %120 {strides = array<i32>} : memref<128x128xf32, #tpu.memory_space<vmem>>, vector<8x128xf32>,
    %c0_104 = arith.constant 0 : index
    %c0_105 = arith.constant 0 : index
    %122 = vector.load %arg7[%c0_104, %c0_105] : memref<128x128xf32, #tpu.memory_space<vmem>>, vector<128x128xf32>
    %c0_106 = arith.constant 0 : index
    %c0_107 = arith.constant 0 : index
    %123 = vector.load %arg4[%c0_106, %c0_107] : memref<1x128xf32, #tpu.memory_space<vmem>>, vector<1x128xf32>
    %124 = vector.broadcast %123 : vector<1x128xf32> to vector<128x128xf32>
    %125 = arith.mulf %122, %124 : vector<128x128xf32>
    %cst_108 = arith.constant dense<0.000000e+00> : vector<128xf32>
    %126 = vector.multi_reduction <add>, %125, %cst_108 [1] : vector<128x128xf32> to vector<128xf32>
    %127 = vector.shape_cast %126 : vector<128xf32> to vector<128x1xf32>
    %c0_109 = arith.constant 0 : index
    %c0_110 = arith.constant 0 : index
    %128 = vector.load %arg5[%c0_109, %c0_110] : memref<1x128xf32, #tpu.memory_space<vmem>>, vector<1x128xf32>
    %129 = vector.broadcast %127 : vector<128x1xf32> to vector<128x128xf32>
    %130 = vector.broadcast %128 : vector<1x128xf32> to vector<128x128xf32>
    %131 = arith.addf %129, %130 : vector<128x128xf32>
    %c0_111 = arith.constant 0 : index
    %c0_112 = arith.constant 0 : index
    %132 = vector.load %arg6[%c0_111, %c0_112] : memref<128x128xf32, #tpu.memory_space<vmem>>, vector<128x128xf32>
    tpu.vector_store %arg6[%c0_111, %c0_112], %131 {strides = array<i32>} : memref<128x128xf32, #tpu.memory_space<vmem>>, vector<128x128xf32>,
    return
  }
}

</mosaic_0001>

<bundles_post_ra>
// kernel: tpu_custom_call.1
= control target key start
LH: loop header
LB: loop body
LE: loop exit
PB: predicated region body
PF: predicated region fallthrough
CT: control target
= control target key end

     0   :  { %v2842_v1 = vmov 0.0   ;;  %vm2843_vm0 = vmmov 0   ;;  %v2844_v3 = vmov 0   ;;  %s3613_s0 = inlined_call_operand.vmem [shape: f32[128,1], index: 0, kind: input, shape index: {}]   ;;  %s3614_s1 = inlined_call_operand.vmem [shape: f32[1,128], index: 1, kind: input, shape index: {}]   ;;  %s3615_s2 = inlined_call_operand.vmem [shape: bf16[128,128], index: 2, kind: input, shape index: {}]   ;;  %s3616_s3 = inlined_call_operand.vmem [shape: f32[1,128], index: 3, kind: input, shape index: {}]   ;;  %s3617_s4 = inlined_call_operand.vmem [shape: f32[1,128], index: 4, kind: input, shape index: {}]   ;;  %s3618_s5 = inlined_call_operand.vmem [shape: f32[1,128], index: 5, kind: input, shape index: {}]   ;;  %s3619_s6 = inlined_call_operand.hbm [shape: f32[128,128], index: 6, kind: output, shape index: {}]  }
   0x1   :  { %v2656_v0 = vld [vmem:[%s3615_s2 + $0x38] sm:$0xff]   ;;  %2328 = vmatprep.subr.bf16.mxu0 %v2842_v1  ;;  %2348 = vmatprep.subr.bf16.mxu1 %v2842_v1  ;;  %v2657_v2 = vld [vmem:[%s3615_s2 + $0x30] sm:$0xff]   ;;  %v2658_v4 = vld [vmem:[%s3615_s2 + $0x28] sm:$0xff]  }
   0x2   :  { %2329 = vmatpush3.bf16.msra.mxu0 %v2656_v0  ;;  %2344 = vmatprep.mubr.msk.bf16.mxu0 %vm2843_vm0, %v2842_v1  ;;  %v25_v5 = vld [vmem:[%s3613_s0] sm:$0xff]  ;;  %v26_v7 = vld [vmem:[%s3613_s0 + $0x8] sm:$0xff]  ;;  %v2660_v8 = vld [vmem:[%s3615_s2 + $0x18] sm:$0xff]  }
   0x3   :  { %2330 = vmatprep.subr.bf16.mxu0 %v2842_v1  ;;  %2654 = vset.pattern.permute.xlu0 %v2844_v3  ;;  %v2659_v6 = vld [vmem:[%s3615_s2 + $0x20] sm:$0xff]   ;;  %v2661_v10 = vld [vmem:[%s3615_s2 + $0x10] sm:$0xff]   ;;  %v2662_v12 = vld [vmem:[%s3615_s2 + $0x8] sm:$0xff]  }
   0x4   :  { %2364 = vmatprep.mubr.msk.bf16.mxu1 %vm2843_vm0, %v2842_v1  ;;  %2655 = vset.pattern.permute.xlu1 %v2844_v3  ;;  %v29_v9 = vld [vmem:[%s3613_s0 + $0x20] sm:$0xff]  ;;  %v31_v11 = vld [vmem:[%s3613_s0 + $0x30] sm:$0xff]  ;;  %v2664_v14 = vld [vmem:[%s3615_s2 + $0x38] sm:$0xff]  }
   0x5   :  { %44 = vperm.xlu0 %2654, %v25_v5   ;;  %v33_v13 = vld [vmem:[%s3613_s0 + $0x40] sm:$0xff]  ;;  %2349 = vmatpush3.bf16.msra.mxu1 %v2664_v14  ;;  %v35_v16 = vld [vmem:[%s3613_s0 + $0x50] sm:$0xff]  ;;  %v2666_v19 = vld [vmem:[%s3615_s2 + $0x28] sm:$0xff]  }
   0x6   :  { %2331 = vmatpush3.bf16.msra.mxu0 %v2657_v2  ;;  %v2663_v15 = vld [vmem:[%s3615_s2] sm:$0xff]   ;;  %2350 = vmatprep.subr.bf16.mxu1 %v2842_v1  ;;  %v2665_v17 = vld [vmem:[%s3615_s2 + $0x30] sm:$0xff]  }
   0x7   :  { %2332 = vmatprep.subr.bf16.mxu0 %v2842_v1  ;;  %v37_v18 = vld [vmem:[%s3613_s0 + $0x60] sm:$0xff]  ;;  %v39_v20 = vld [vmem:[%s3613_s0 + $0x70] sm:$0xff] }
   0x9   :  { %49 = vperm.xlu0 %2654, %v26_v7   ;;  %2351 = vmatpush3.bf16.msra.mxu1 %v2665_v17 }
   0xa   :  { %2333 = vmatpush3.bf16.msra.mxu0 %v2658_v4  ;;  %2352 = vmatprep.subr.bf16.mxu1 %v2842_v1 }
   0xb   :  { %2334 = vmatprep.subr.bf16.mxu0 %v2842_v1 }
   0xd   :  { %64 = vperm.xlu0 %2654, %v29_v9   ;;  %2353 = vmatpush3.bf16.msra.mxu1 %v2666_v19 }
   0xe   :  { %2335 = vmatpush3.bf16.msra.mxu0 %v2659_v6  ;;  %2354 = vmatprep.subr.bf16.mxu1 %v2842_v1 }
   0xf   :  { %2336 = vmatprep.subr.bf16.mxu0 %v2842_v1 }
  0x11   :  { %74 = vperm.xlu0 %2654, %v31_v11  }
  0x12   :  { %2337 = vmatpush3.bf16.msra.mxu0 %v2660_v8 }
  0x13   :  { %2338 = vmatprep.subr.bf16.mxu0 %v2842_v1 }
  0x15   :  { %84 = vperm.xlu0 %2654, %v33_v13  }
  0x16   :  { %2339 = vmatpush3.bf16.msra.mxu0 %v2661_v10 }
  0x17   :  { %2340 = vmatprep.subr.bf16.mxu0 %v2842_v1 }
  0x19   :  { %94 = vperm.xlu0 %2654, %v35_v16  }
  0x1a   :  { %2341 = vmatpush3.bf16.msra.mxu0 %v2662_v12 }
  0x1b   :  { %2342 = vmatprep.subr.bf16.mxu0 %v2842_v1 }
  0x1d   :  { %104 = vperm.xlu0 %2654, %v37_v18  }
  0x1e   :  { %2343 = vmatpush3.bf16.msra.mxu0 %v2663_v15 }
  0x1f   :  { %2368 = vmatprep.subr.bf16.mxu0 %v2842_v1 }
  0x21   :  { %2345 = vmatmul.mubr.bf16.vlgmr.msra.gmra.mxu0 %v2844_v3  ;;  %114 = vperm.xlu0 %2654, %v39_v20  }
  0x22   :  { %2384 = vmatprep.mubr.msk.bf16.mxu0 %vm2843_vm0, %v2842_v1 }
  0x23   :  { %11 = vsyncpa [#allocation4], 0  ;;  %v2667_v21 = vld [vmem:[%s3615_s2 + $0x20] sm:$0xff]   ;;  %v2668_v22 = vld [vmem:[%s3615_s2 + $0x18] sm:$0xff]  }
  0x24   :  { %2355 = vmatpush3.bf16.msra.mxu1 %v2667_v21  ;;  %v2669_v23 = vld [vmem:[%s3615_s2 + $0x10] sm:$0xff]   ;;  %v2670_v24 = vld [vmem:[%s3615_s2 + $0x8] sm:$0xff]   ;;  %v2671_v25 = vld [vmem:[%s3615_s2] sm:$0xff]  }
  0x25   :  { %2356 = vmatprep.subr.bf16.mxu1 %v2842_v1  ;;  %v2982_v26 = vld [vmem:[%s3614_s1] ss:$0 sm:$0xff]  ;;  %v27_v40 = vld [vmem:[%s3613_s0 + $0x10] sm:$0xff]  ;;  %v28_v41 = vld [vmem:[%s3613_s0 + $0x18] sm:$0xff] }
  0x26   :  { %v2988_v29 = vld [vmem:[%s3616_s3] ss:$0 sm:$0xff]  ;;  %54 = vperm.xlu1 %2655, %v27_v40   ;;  %v2672_v42 = vld [vmem:[%s3615_s2 + $0x38] sm:$0xff]   ;;  %v2673_v43 = vld [vmem:[%s3615_s2 + $0x30] sm:$0xff]  }
  0x27   :  { %v2994_v36 = vld [vmem:[%s3617_s4] ss:$0 sm:$0xff]  ;;  %2369 = vmatpush3.bf16.msra.mxu0 %v2672_v42  ;;  %v30_v44 = vld [vmem:[%s3613_s0 + $0x28] sm:$0xff]  ;;  %v32_v46 = vld [vmem:[%s3613_s0 + $0x38] sm:$0xff] }
  0x28   :  { %2357 = vmatpush3.bf16.msra.mxu1 %v2668_v22  ;;  %2370 = vmatprep.subr.bf16.mxu0 %v2842_v1  ;;  %v2674_v45 = vld [vmem:[%s3615_s2 + $0x28] sm:$0xff]   ;;  %v36_v48 = vld [vmem:[%s3613_s0 + $0x58] sm:$0xff]  ;;  %v2675_v51 = vld [vmem:[%s3615_s2 + $0x20] sm:$0xff]  }
  0x29   :  { %2358 = vmatprep.subr.bf16.mxu1 %v2842_v1  ;;  %v34_v47 = vld [vmem:[%s3613_s0 + $0x48] sm:$0xff]  ;;  %v40_v50 = vld [vmem:[%s3613_s0 + $0x78] sm:$0xff]  ;;  %v2677_v53 = vld [vmem:[%s3615_s2 + $0x10] sm:$0xff]  }
  0x2a   :  { %59 = vperm.xlu1 %2655, %v28_v41   ;;  %v38_v49 = vld [vmem:[%s3613_s0 + $0x68] sm:$0xff]  ;;  %v2676_v52 = vld [vmem:[%s3615_s2 + $0x18] sm:$0xff]   ;;  %v2679_v55 = vld [vmem:[%s3615_s2] sm:$0xff]  }
  0x2b   :  { %2371 = vmatpush3.bf16.msra.mxu0 %v2673_v43  ;;  %v2678_v54 = vld [vmem:[%s3615_s2 + $0x8] sm:$0xff]   ;;  %v3070_v63 = vld [vmem:[%s3618_s5] ss:$0 sm:$0xff]  ;;  %v2680_v13 = vld [vmem:[%s3615_s2 + $0x38] sm:$0xff]  }
  0x2c   :  { %2359 = vmatpush3.bf16.msra.mxu1 %v2669_v23  ;;  %2372 = vmatprep.subr.bf16.mxu0 %v2842_v1  ;;  %v2681_v14 = vld [vmem:[%s3615_s2 + $0x30] sm:$0xff]   ;;  %v2682_v15 = vld [vmem:[%s3615_s2 + $0x28] sm:$0xff]   ;;  %v2683_v16 = vld [vmem:[%s3615_s2 + $0x20] sm:$0xff]  }
  0x2d   :  { %2360 = vmatprep.subr.bf16.mxu1 %v2842_v1  ;;  %v2684_v17 = vld [vmem:[%s3615_s2 + $0x18] sm:$0xff]   ;;  %v2685_v18 = vld [vmem:[%s3615_s2 + $0x10] sm:$0xff]   ;;  %v2686_v19 = vld [vmem:[%s3615_s2 + $0x8] sm:$0xff]  }
  0x2e   :  { %69 = vperm.xlu1 %2655, %v30_v44   ;;  %v2687_v20 = vld [vmem:[%s3615_s2] sm:$0xff]   ;;  %v2688_v44 = vld [vmem:[%s3615_s2 + $0x38] sm:$0xff]  }
  0x2f   :  { %2373 = vmatpush3.bf16.msra.mxu0 %v2674_v45  ;;  %v2689_v45 = vld [vmem:[%s3615_s2 + $0x30] sm:$0xff]  }
  0x30   :  { %2361 = vmatpush3.bf16.msra.mxu1 %v2670_v24  ;;  %2374 = vmatprep.subr.bf16.mxu0 %v2842_v1 }
  0x31   :  { %2362 = vmatprep.subr.bf16.mxu1 %v2842_v1 }
  0x32   :  { %79 = vperm.xlu1 %2655, %v32_v46   ;;  %v2690_v46 = vld [vmem:[%s3615_s2 + $0x28] sm:$0xff]  }
  0x33   :  { %2375 = vmatpush3.bf16.msra.mxu0 %v2675_v51  ;;  %v2695_v51 = vld [vmem:[%s3615_s2] sm:$0xff]  }
  0x34   :  { %2363 = vmatpush3.bf16.msra.mxu1 %v2671_v25  ;;  %2376 = vmatprep.subr.bf16.mxu0 %v2842_v1 }
  0x35   :  { %2388 = vmatprep.subr.bf16.mxu1 %v2842_v1 }
  0x36   :  { %89 = vperm.xlu1 %2655, %v34_v47   ;;  %v2691_v47 = vld [vmem:[%s3615_s2 + $0x20] sm:$0xff]  }
  0x37   :  { %2377 = vmatpush3.bf16.msra.mxu0 %v2676_v52 }
  0x38   :  { %2378 = vmatprep.subr.bf16.mxu0 %v2842_v1 }
  0x3a   :  { %99 = vperm.xlu1 %2655, %v36_v48   ;;  %v2692_v48 = vld [vmem:[%s3615_s2 + $0x18] sm:$0xff]  }
  0x3b   :  { %2379 = vmatpush3.bf16.msra.mxu0 %v2677_v53 }
  0x3c   :  { %2380 = vmatprep.subr.bf16.mxu0 %v2842_v1 }
  0x3e   :  { %109 = vperm.xlu1 %2655, %v38_v49   ;;  %v2693_v49 = vld [vmem:[%s3615_s2 + $0x10] sm:$0xff]  }
  0x3f   :  { %2381 = vmatpush3.bf16.msra.mxu0 %v2678_v54 }
  0x40   :  { %2382 = vmatprep.subr.bf16.mxu0 %v2842_v1 }
  0x42   :  { %119 = vperm.xlu1 %2655, %v40_v50   ;;  %v2694_v50 = vld [vmem:[%s3615_s2 + $0x8] sm:$0xff]  }
  0x43   :  { %2383 = vmatpush3.bf16.msra.mxu0 %v2679_v55 }
  0x44   :  { %2408 = vmatprep.subr.bf16.mxu0 %v2842_v1 }
  0x80   :  { %v45_v27 = vpop.permute.xlu0 %44 }
  0x81   :  { %v128_v28 = vmul.f32 %v2982_v26, %v45_v27 }
  0x83   :  { %v151_v30 = vadd.f32 %v2988_v29, %v128_v28 }
  0x84   :  { %v50_v56 = vpop.permute.xlu0 %49 }
  0x85   :  { %v129_v3 = vmul.f32 %v2982_v26, %v50_v56 }
  0x87   :  { %v152_v4 = vadd.f32 %v2988_v29, %v129_v3 }
  0x88   :  { %v3055_v57 = vpop.permute.xlu0 %64 }
  0x8c   :  { %v3057_v58 = vpop.permute.xlu0 %74 }
  0x90   :  { %v3059_v59 = vpop.permute.xlu0 %84 }
  0x94   :  { %v3061_v60 = vpop.permute.xlu0 %94 }
  0x98   :  { %v3063_v61 = vpop.permute.xlu0 %104 }
  0x9c   :  { %v3065_v62 = vpop.permute.xlu0 %114 }
  0xa1   :  { %v55_v21 = vpop.permute.xlu1 %54 }
  0xa5   :  { %v60_v22 = vpop.permute.xlu1 %59 }
  0xa6   :  { %v131_v54 = vmul.f32 %v2982_v26, %v60_v22 }
  0xa8   :  { %v154_v55 = vadd.f32 %v2988_v29, %v131_v54 }
  0xa9   :  { %v3110_v23 = vpop.permute.xlu1 %69 }
  0xad   :  { %v3112_v24 = vpop.permute.xlu1 %79 }
  0xb1   :  { %v3114_v25 = vpop.permute.xlu1 %89 }
  0xb5   :  { %v3116_v27 = vpop.permute.xlu1 %99 }
  0xb9   :  { %v3118_v28 = vpop.permute.xlu1 %109 }
  0xe1   :  { %v282_v31 = vpop.f32.mrf.mxu0 }
  0xe2   :  { %v288_v32 = vadd.f32 %v282_v31, %v151_v30  ;;  %v3120_v30 = vpop.permute.xlu1 %119 }
  0xe3   :  { %v2346_v33 = vpop.f32.mrf.mxu0 }
  0xe4   :  { %2784 = vtanh.f32 %v288_v32  ;;  %v130_v33 = vmul.f32 %v2982_v26, %v55_v21 }
  0xe5   :  { %v285_v34 = vpop.f32.mrf.mxu0 }
  0xe6   :  { %v153_v34 = vadd.f32 %v2988_v29, %v130_v33 }
  0xe7   :  { %v2347_v35 = vpop.f32.mrf.mxu0 }
  0xf1   :  { %v2785_v37 = vpop.eup %2784 }
  0xf2   :  { %v1949_v38 = vmul.f32 %v2785_v37, %v2994_v36  ;;  %v292_v39 = vpack.c.bf16 %v2785_v37, %v2785_v37 }
  0xf4   :  { %1965 = vadd.xlane.f32.xlu0 %v1949_v38  ;;  %2365 = vmatmul.mubr.bf16.vlgmr.msra.gmra.mxu1 %v292_v39 }
  0xf5   :  { %2404 = vmatprep.mubr.msk.bf16.mxu1 %vm2843_vm0, %v2842_v1  ;;  %2389 = vmatpush3.bf16.msra.mxu1 %v2680_v13  ;;  %v2701_v13 = vld [vmem:[%s3615_s2 + $0x10] sm:$0xff]  }
  0xf6   :  { %2390 = vmatprep.subr.bf16.mxu1 %v2842_v1 }
  0xf9   :  { %2391 = vmatpush3.bf16.msra.mxu1 %v2681_v14  ;;  %v2702_v14 = vld [vmem:[%s3615_s2 + $0x8] sm:$0xff]  }
  0xfa   :  { %2392 = vmatprep.subr.bf16.mxu1 %v2842_v1 }
  0xfd   :  { %2393 = vmatpush3.bf16.msra.mxu1 %v2682_v15  ;;  %v2703_v15 = vld [vmem:[%s3615_s2] sm:$0xff]  }
  0xfe   :  { %2394 = vmatprep.subr.bf16.mxu1 %v2842_v1 }
 0x101   :  { %2395 = vmatpush3.bf16.msra.mxu1 %v2683_v16 }
 0x102   :  { %2396 = vmatprep.subr.bf16.mxu1 %v2842_v1 }
 0x105   :  { %2397 = vmatpush3.bf16.msra.mxu1 %v2684_v17 }
 0x106   :  { %2398 = vmatprep.subr.bf16.mxu1 %v2842_v1 }
 0x109   :  { %2399 = vmatpush3.bf16.msra.mxu1 %v2685_v18  ;;  %v132_v18 = vmul.f32 %v2982_v26, %v3055_v57  ;;  %v2704_v57 = vld [vmem:[%s3615_s2 + $0x38] sm:$0xff]  }
 0x10a   :  { %2400 = vmatprep.subr.bf16.mxu1 %v2842_v1 }
 0x10d   :  { %2401 = vmatpush3.bf16.msra.mxu1 %v2686_v19  ;;  %v155_v19 = vadd.f32 %v2988_v29, %v132_v18 }
 0x10e   :  { %2402 = vmatprep.subr.bf16.mxu1 %v2842_v1 }
 0x111   :  { %2403 = vmatpush3.bf16.msra.mxu1 %v2687_v20 }
 0x112   :  { %2428 = vmatprep.subr.bf16.mxu1 %v2842_v1 }
 0x17d   :  { %v1966_v0 = vpop.xlane.xlu0 %1965 }
 0x17e   :  { %v2004_v2 = vadd.f32 %v3070_v63, %v1966_v0 }
 0x180   :  { %2020 = vst [vmem:[#allocation3] sm:$0xff] %v2004_v2 }
 0x1b4   :  { %v391_v5 = vpop.f32.mrf.mxu1 }
 0x1b5   :  { %v397_v6 = vadd.f32 %v391_v5, %v152_v4 }
 0x1b6   :  { %v2366_v7 = vpop.f32.mrf.mxu1 }
 0x1b7   :  { %2786 = vtanh.f32 %v397_v6 }
 0x1b8   :  { %v394_v8 = vpop.f32.mrf.mxu1 }
 0x1b9   :  { %v2696_v8 = vld [vmem:[%s3615_s2 + $0x38] sm:$0xff]  }
 0x1ba   :  { %v2367_v9 = vpop.f32.mrf.mxu1 }
 0x1bb   :  { %v2697_v9 = vld [vmem:[%s3615_s2 + $0x30] sm:$0xff]  }
 0x1c4   :  { %v2787_v10 = vpop.eup %2786 }
 0x1c5   :  { %v1950_v11 = vmul.f32 %v2787_v10, %v2994_v36  ;;  %v401_v12 = vpack.c.bf16 %v2787_v10, %v2787_v10  ;;  %v2698_v10 = vld [vmem:[%s3615_s2 + $0x28] sm:$0xff]  }
 0x1c7   :  { %1967 = vadd.xlane.f32.xlu1 %v1950_v11  ;;  %2385 = vmatmul.mubr.bf16.vlgmr.msra.gmra.mxu0 %v401_v12  ;;  %v2699_v11 = vld [vmem:[%s3615_s2 + $0x20] sm:$0xff]   ;;  %v2700_v12 = vld [vmem:[%s3615_s2 + $0x18] sm:$0xff]  }
 0x1c8   :  { %2424 = vmatprep.mubr.msk.bf16.mxu0 %vm2843_vm0, %v2842_v1  ;;  %2409 = vmatpush3.bf16.msra.mxu0 %v2688_v44 }
 0x1c9   :  { %2410 = vmatprep.subr.bf16.mxu0 %v2842_v1 }
 0x1cc   :  { %2411 = vmatpush3.bf16.msra.mxu0 %v2689_v45 }
 0x1cd   :  { %2412 = vmatprep.subr.bf16.mxu0 %v2842_v1 }
 0x1d0   :  { %2413 = vmatpush3.bf16.msra.mxu0 %v2690_v46  ;;  %v133_v46 = vmul.f32 %v2982_v26, %v3110_v23  ;;  %v2712_v23 = vld [vmem:[%s3615_s2 + $0x38] sm:$0xff]  }
 0x1d1   :  { %2414 = vmatprep.subr.bf16.mxu0 %v2842_v1 }
 0x1d4   :  { %2415 = vmatpush3.bf16.msra.mxu0 %v2691_v47  ;;  %v156_v47 = vadd.f32 %v2988_v29, %v133_v46  ;;  %v2729_v46 = vld [vmem:[%s3615_s2 + $0x30] sm:$0xff]  }
 0x1d5   :  { %2416 = vmatprep.subr.bf16.mxu0 %v2842_v1 }
 0x1d8   :  { %2417 = vmatpush3.bf16.msra.mxu0 %v2692_v48 }
 0x1d9   :  { %2418 = vmatprep.subr.bf16.mxu0 %v2842_v1 }
 0x1dc   :  { %2419 = vmatpush3.bf16.msra.mxu0 %v2693_v49 }
 0x1dd   :  { %2420 = vmatprep.subr.bf16.mxu0 %v2842_v1 }
 0x1e0   :  { %2421 = vmatpush3.bf16.msra.mxu0 %v2694_v50 }
 0x1e1   :  { %2422 = vmatprep.subr.bf16.mxu0 %v2842_v1 }
 0x1e4   :  { %2423 = vmatpush3.bf16.msra.mxu0 %v2695_v51 }
 0x1e5   :  { %2448 = vmatprep.subr.bf16.mxu0 %v2842_v1 }
 0x250   :  { %v1968_v31 = vpop.xlane.xlu1 %1967 }
 0x251   :  { %v2005_v32 = vadd.f32 %v3070_v63, %v1968_v31 }
 0x253   :  { %2021 = vst [vmem:[#allocation3 + $0x8] sm:$0xff] %v2005_v32 }
 0x287   :  { %v500_v35 = vpop.f32.mrf.mxu0 }
 0x288   :  { %v506_v37 = vadd.f32 %v500_v35, %v153_v34 }
 0x289   :  { %v2386_v38 = vpop.f32.mrf.mxu0 }
 0x28a   :  { %2788 = vtanh.f32 %v506_v37  ;;  %v2705_v37 = vld [vmem:[%s3615_s2 + $0x30] sm:$0xff]   ;;  %v2706_v38 = vld [vmem:[%s3615_s2 + $0x28] sm:$0xff]  }
 0x28b   :  { %v503_v39 = vpop.f32.mrf.mxu0 }
 0x28c   :  { %v2707_v39 = vld [vmem:[%s3615_s2 + $0x20] sm:$0xff]  }
 0x28d   :  { %v2387_v40 = vpop.f32.mrf.mxu0 }
 0x28e   :  { %v2708_v40 = vld [vmem:[%s3615_s2 + $0x18] sm:$0xff]  }
 0x297   :  { %v2789_v41 = vpop.eup %2788 }
 0x298   :  { %v1951_v42 = vmul.f32 %v2789_v41, %v2994_v36  ;;  %v510_v43 = vpack.c.bf16 %v2789_v41, %v2789_v41  ;;  %v2709_v41 = vld [vmem:[%s3615_s2 + $0x10] sm:$0xff]  }
 0x29a   :  { %1969 = vadd.xlane.f32.xlu0 %v1951_v42  ;;  %2405 = vmatmul.mubr.bf16.vlgmr.msra.gmra.mxu1 %v510_v43  ;;  %v2710_v42 = vld [vmem:[%s3615_s2 + $0x8] sm:$0xff]   ;;  %v2711_v43 = vld [vmem:[%s3615_s2] sm:$0xff]  }
 0x29b   :  { %2444 = vmatprep.mubr.msk.bf16.mxu1 %vm2843_vm0, %v2842_v1  ;;  %2429 = vmatpush3.bf16.msra.mxu1 %v2696_v8 }
 0x29c   :  { %2430 = vmatprep.subr.bf16.mxu1 %v2842_v1 }
 0x29f   :  { %2431 = vmatpush3.bf16.msra.mxu1 %v2697_v9  ;;  %v134_v9 = vmul.f32 %v2982_v26, %v3057_v58  ;;  %v2720_v58 = vld [vmem:[%s3615_s2 + $0x38] sm:$0xff]  }
 0x2a0   :  { %2432 = vmatprep.subr.bf16.mxu1 %v2842_v1 }
 0x2a3   :  { %2433 = vmatpush3.bf16.msra.mxu1 %v2698_v10  ;;  %v157_v10 = vadd.f32 %v2988_v29, %v134_v9  ;;  %v2738_v9 = vld [vmem:[%s3615_s2 + $0x28] sm:$0xff]  }
 0x2a4   :  { %2434 = vmatprep.subr.bf16.mxu1 %v2842_v1 }
 0x2a7   :  { %2435 = vmatpush3.bf16.msra.mxu1 %v2699_v11 }
 0x2a8   :  { %2436 = vmatprep.subr.bf16.mxu1 %v2842_v1 }
 0x2ab   :  { %2437 = vmatpush3.bf16.msra.mxu1 %v2700_v12 }
 0x2ac   :  { %2438 = vmatprep.subr.bf16.mxu1 %v2842_v1 }
 0x2af   :  { %2439 = vmatpush3.bf16.msra.mxu1 %v2701_v13 }
 0x2b0   :  { %2440 = vmatprep.subr.bf16.mxu1 %v2842_v1 }
 0x2b3   :  { %2441 = vmatpush3.bf16.msra.mxu1 %v2702_v14 }
 0x2b4   :  { %2442 = vmatprep.subr.bf16.mxu1 %v2842_v1 }
 0x2b7   :  { %2443 = vmatpush3.bf16.msra.mxu1 %v2703_v15 }
 0x2b8   :  { %2468 = vmatprep.subr.bf16.mxu1 %v2842_v1 }
 0x323   :  { %v1970_v52 = vpop.xlane.xlu0 %1969 }
 0x324   :  { %v2006_v53 = vadd.f32 %v3070_v63, %v1970_v52 }
 0x326   :  { %2022 = vst [vmem:[#allocation3 + $0x10] sm:$0xff] %v2006_v53 }
 0x35a   :  { %v609_v56 = vpop.f32.mrf.mxu1 }
 0x35b   :  { %v615_v0 = vadd.f32 %v609_v56, %v154_v55  ;;  %v2713_v56 = vld [vmem:[%s3615_s2 + $0x30] sm:$0xff]  }
 0x35c   :  { %v2406_v2 = vpop.f32.mrf.mxu1 }
 0x35d   :  { %2790 = vtanh.f32 %v615_v0  ;;  %v2714_v0 = vld [vmem:[%s3615_s2 + $0x28] sm:$0xff]   ;;  %v2715_v2 = vld [vmem:[%s3615_s2 + $0x20] sm:$0xff]  }
 0x35e   :  { %v612_v3 = vpop.f32.mrf.mxu1 }
 0x35f   :  { %v2716_v3 = vld [vmem:[%s3615_s2 + $0x18] sm:$0xff]  }
 0x360   :  { %v2407_v4 = vpop.f32.mrf.mxu1 }
 0x361   :  { %v2717_v4 = vld [vmem:[%s3615_s2 + $0x10] sm:$0xff]  }
 0x36a   :  { %v2791_v5 = vpop.eup %2790 }
 0x36b   :  { %v1952_v6 = vmul.f32 %v2791_v5, %v2994_v36  ;;  %v619_v7 = vpack.c.bf16 %v2791_v5, %v2791_v5  ;;  %v2718_v5 = vld [vmem:[%s3615_s2 + $0x8] sm:$0xff]  }
 0x36d   :  { %1971 = vadd.xlane.f32.xlu0 %v1952_v6  ;;  %2425 = vmatmul.mubr.bf16.vlgmr.msra.gmra.mxu0 %v619_v7  ;;  %v2719_v6 = vld [vmem:[%s3615_s2] sm:$0xff]  }
 0x36e   :  { %2464 = vmatprep.mubr.msk.bf16.mxu0 %vm2843_vm0, %v2842_v1  ;;  %2449 = vmatpush3.bf16.msra.mxu0 %v2704_v57  ;;  %v135_v57 = vmul.f32 %v2982_v26, %v3112_v24  ;;  %v2728_v24 = vld [vmem:[%s3615_s2 + $0x38] sm:$0xff]  }
 0x36f   :  { %2450 = vmatprep.subr.bf16.mxu0 %v2842_v1 }
 0x372   :  { %2451 = vmatpush3.bf16.msra.mxu0 %v2705_v37  ;;  %v158_v37 = vadd.f32 %v2988_v29, %v135_v57  ;;  %v2747_v57 = vld [vmem:[%s3615_s2 + $0x20] sm:$0xff]  }
 0x373   :  { %2452 = vmatprep.subr.bf16.mxu0 %v2842_v1 }
 0x376   :  { %2453 = vmatpush3.bf16.msra.mxu0 %v2706_v38 }
 0x377   :  { %2454 = vmatprep.subr.bf16.mxu0 %v2842_v1 }
 0x37a   :  { %2455 = vmatpush3.bf16.msra.mxu0 %v2707_v39 }
 0x37b   :  { %2456 = vmatprep.subr.bf16.mxu0 %v2842_v1 }
 0x37e   :  { %2457 = vmatpush3.bf16.msra.mxu0 %v2708_v40 }
 0x37f   :  { %2458 = vmatprep.subr.bf16.mxu0 %v2842_v1 }
 0x382   :  { %2459 = vmatpush3.bf16.msra.mxu0 %v2709_v41 }
 0x383   :  { %2460 = vmatprep.subr.bf16.mxu0 %v2842_v1 }
 0x386   :  { %2461 = vmatpush3.bf16.msra.mxu0 %v2710_v42 }
 0x387   :  { %2462 = vmatprep.subr.bf16.mxu0 %v2842_v1 }
 0x38a   :  { %2463 = vmatpush3.bf16.msra.mxu0 %v2711_v43 }
 0x38b   :  { %2488 = vmatprep.subr.bf16.mxu0 %v2842_v1 }
 0x3f6   :  { %v1972_v16 = vpop.xlane.xlu0 %1971 }
 0x3f7   :  { %v2007_v17 = vadd.f32 %v3070_v63, %v1972_v16 }
 0x3f9   :  { %2023 = vst [vmem:[#allocation3 + $0x18] sm:$0xff] %v2007_v17 }
 0x42d   :  { %v718_v20 = vpop.f32.mrf.mxu0 }
 0x42e   :  { %v724_v21 = vadd.f32 %v718_v20, %v155_v19  ;;  %v2721_v19 = vld [vmem:[%s3615_s2 + $0x30] sm:$0xff]   ;;  %v2722_v20 = vld [vmem:[%s3615_s2 + $0x28] sm:$0xff]  }
 0x42f   :  { %v2426_v22 = vpop.f32.mrf.mxu0 }
 0x430   :  { %2792 = vtanh.f32 %v724_v21  ;;  %v2723_v21 = vld [vmem:[%s3615_s2 + $0x20] sm:$0xff]   ;;  %v2724_v22 = vld [vmem:[%s3615_s2 + $0x18] sm:$0xff]  }
 0x431   :  { %v721_v31 = vpop.f32.mrf.mxu0 }
 0x432   :  { %v2725_v31 = vld [vmem:[%s3615_s2 + $0x10] sm:$0xff]  }
 0x433   :  { %v2427_v32 = vpop.f32.mrf.mxu0 }
 0x434   :  { %v2726_v32 = vld [vmem:[%s3615_s2 + $0x8] sm:$0xff]  }
 0x43d   :  { %v2793_v33 = vpop.eup %2792 }
 0x43e   :  { %v1953_v34 = vmul.f32 %v2793_v33, %v2994_v36  ;;  %v728_v35 = vpack.c.bf16 %v2793_v33, %v2793_v33  ;;  %v2727_v33 = vld [vmem:[%s3615_s2] sm:$0xff]  }
 0x440   :  { %1973 = vadd.xlane.f32.xlu1 %v1953_v34  ;;  %2445 = vmatmul.mubr.bf16.vlgmr.msra.gmra.mxu1 %v728_v35 }
 0x441   :  { %2484 = vmatprep.mubr.msk.bf16.mxu1 %vm2843_vm0, %v2842_v1  ;;  %2469 = vmatpush3.bf16.msra.mxu1 %v2712_v23 }
 0x442   :  { %2470 = vmatprep.subr.bf16.mxu1 %v2842_v1 }
 0x445   :  { %2471 = vmatpush3.bf16.msra.mxu1 %v2713_v56 }
 0x446   :  { %2472 = vmatprep.subr.bf16.mxu1 %v2842_v1 }
 0x449   :  { %2473 = vmatpush3.bf16.msra.mxu1 %v2714_v0 }
 0x44a   :  { %2474 = vmatprep.subr.bf16.mxu1 %v2842_v1 }
 0x44d   :  { %2475 = vmatpush3.bf16.msra.mxu1 %v2715_v2 }
 0x44e   :  { %2476 = vmatprep.subr.bf16.mxu1 %v2842_v1 }
 0x451   :  { %2477 = vmatpush3.bf16.msra.mxu1 %v2716_v3 }
 0x452   :  { %2478 = vmatprep.subr.bf16.mxu1 %v2842_v1 }
 0x455   :  { %2479 = vmatpush3.bf16.msra.mxu1 %v2717_v4 }
 0x456   :  { %2480 = vmatprep.subr.bf16.mxu1 %v2842_v1 }
 0x459   :  { %2481 = vmatpush3.bf16.msra.mxu1 %v2718_v5 }
 0x45a   :  { %2482 = vmatprep.subr.bf16.mxu1 %v2842_v1 }
 0x45d   :  { %2483 = vmatpush3.bf16.msra.mxu1 %v2719_v6 }
 0x45e   :  { %2508 = vmatprep.subr.bf16.mxu1 %v2842_v1 }
 0x4c9   :  { %v1974_v44 = vpop.xlane.xlu1 %1973 }
 0x4ca   :  { %v2008_v45 = vadd.f32 %v3070_v63, %v1974_v44 }
 0x4cc   :  { %2024 = vst [vmem:[#allocation3 + $0x20] sm:$0xff] %v2008_v45 }
 0x500   :  { %v827_v48 = vpop.f32.mrf.mxu1 }
 0x501   :  { %v833_v49 = vadd.f32 %v827_v48, %v156_v47  ;;  %v2730_v47 = vld [vmem:[%s3615_s2 + $0x28] sm:$0xff]   ;;  %v2731_v48 = vld [vmem:[%s3615_s2 + $0x20] sm:$0xff]  }
 0x502   :  { %v2446_v50 = vpop.f32.mrf.mxu1 }
 0x503   :  { %2794 = vtanh.f32 %v833_v49  ;;  %v2732_v49 = vld [vmem:[%s3615_s2 + $0x18] sm:$0xff]   ;;  %v2733_v50 = vld [vmem:[%s3615_s2 + $0x10] sm:$0xff]  }
 0x504   :  { %v830_v51 = vpop.f32.mrf.mxu1 }
 0x505   :  { %v2734_v51 = vld [vmem:[%s3615_s2 + $0x8] sm:$0xff]  }
 0x506   :  { %v2447_v52 = vpop.f32.mrf.mxu1 }
 0x507   :  { %v2735_v52 = vld [vmem:[%s3615_s2] sm:$0xff]  }
 0x510   :  { %v2795_v53 = vpop.eup %2794 }
 0x511   :  { %v1954_v54 = vmul.f32 %v2795_v53, %v2994_v36  ;;  %v837_v55 = vpack.c.bf16 %v2795_v53, %v2795_v53 }
 0x513   :  { %1975 = vadd.xlane.f32.xlu0 %v1954_v54  ;;  %2465 = vmatmul.mubr.bf16.vlgmr.msra.gmra.mxu0 %v837_v55  ;;  %v136_v55 = vmul.f32 %v2982_v26, %v3059_v59  ;;  %v2736_v59 = vld [vmem:[%s3615_s2 + $0x38] sm:$0xff]  }
 0x514   :  { %2504 = vmatprep.mubr.msk.bf16.mxu0 %vm2843_vm0, %v2842_v1  ;;  %2489 = vmatpush3.bf16.msra.mxu0 %v2720_v58 }
 0x515   :  { %2490 = vmatprep.subr.bf16.mxu0 %v2842_v1  ;;  %v159_v23 = vadd.f32 %v2988_v29, %v136_v55  ;;  %v2756_v55 = vld [vmem:[%s3615_s2 + $0x18] sm:$0xff]  }
 0x518   :  { %2491 = vmatpush3.bf16.msra.mxu0 %v2721_v19 }
 0x519   :  { %2492 = vmatprep.subr.bf16.mxu0 %v2842_v1 }
 0x51c   :  { %2493 = vmatpush3.bf16.msra.mxu0 %v2722_v20 }
 0x51d   :  { %2494 = vmatprep.subr.bf16.mxu0 %v2842_v1 }
 0x520   :  { %2495 = vmatpush3.bf16.msra.mxu0 %v2723_v21 }
 0x521   :  { %2496 = vmatprep.subr.bf16.mxu0 %v2842_v1 }
 0x524   :  { %2497 = vmatpush3.bf16.msra.mxu0 %v2724_v22 }
 0x525   :  { %2498 = vmatprep.subr.bf16.mxu0 %v2842_v1 }
 0x528   :  { %2499 = vmatpush3.bf16.msra.mxu0 %v2725_v31 }
 0x529   :  { %2500 = vmatprep.subr.bf16.mxu0 %v2842_v1 }
 0x52c   :  { %2501 = vmatpush3.bf16.msra.mxu0 %v2726_v32 }
 0x52d   :  { %2502 = vmatprep.subr.bf16.mxu0 %v2842_v1 }
 0x530   :  { %2503 = vmatpush3.bf16.msra.mxu0 %v2727_v33 }
 0x531   :  { %2528 = vmatprep.subr.bf16.mxu0 %v2842_v1 }
 0x59c   :  { %v1976_v7 = vpop.xlane.xlu0 %1975 }
 0x59d   :  { %v2009_v8 = vadd.f32 %v3070_v63, %v1976_v7 }
 0x59f   :  { %2025 = vst [vmem:[#allocation3 + $0x28] sm:$0xff] %v2009_v8  ;;  %v2737_v8 = vld [vmem:[%s3615_s2 + $0x30] sm:$0xff]  }
 0x5d3   :  { %v936_v11 = vpop.f32.mrf.mxu0 }
 0x5d4   :  { %v942_v12 = vadd.f32 %v936_v11, %v157_v10  ;;  %v2739_v10 = vld [vmem:[%s3615_s2 + $0x20] sm:$0xff]   ;;  %v2740_v11 = vld [vmem:[%s3615_s2 + $0x18] sm:$0xff]  }
 0x5d5   :  { %v2466_v13 = vpop.f32.mrf.mxu0 }
 0x5d6   :  { %2796 = vtanh.f32 %v942_v12  ;;  %v2741_v12 = vld [vmem:[%s3615_s2 + $0x10] sm:$0xff]   ;;  %v2742_v13 = vld [vmem:[%s3615_s2 + $0x8] sm:$0xff]  }
 0x5d7   :  { %v939_v14 = vpop.f32.mrf.mxu0 }
 0x5d8   :  { %v2743_v14 = vld [vmem:[%s3615_s2] sm:$0xff]  }
 0x5d9   :  { %v2467_v15 = vpop.f32.mrf.mxu0 }
 0x5e3   :  { %v2797_v16 = vpop.eup %2796 }
 0x5e4   :  { %v1955_v17 = vmul.f32 %v2797_v16, %v2994_v36  ;;  %v946_v18 = vpack.c.bf16 %v2797_v16, %v2797_v16 }
 0x5e6   :  { %1977 = vadd.xlane.f32.xlu1 %v1955_v17  ;;  %2485 = vmatmul.mubr.bf16.vlgmr.msra.gmra.mxu1 %v946_v18  ;;  %v137_v17 = vmul.f32 %v2982_v26, %v3114_v25  ;;  %v2744_v25 = vld [vmem:[%s3615_s2 + $0x38] sm:$0xff]  }
 0x5e7   :  { %2524 = vmatprep.mubr.msk.bf16.mxu1 %vm2843_vm0, %v2842_v1  ;;  %2509 = vmatpush3.bf16.msra.mxu1 %v2728_v24 }
 0x5e8   :  { %2510 = vmatprep.subr.bf16.mxu1 %v2842_v1  ;;  %v160_v18 = vadd.f32 %v2988_v29, %v137_v17 }
 0x5eb   :  { %2511 = vmatpush3.bf16.msra.mxu1 %v2729_v46 }
 0x5ec   :  { %2512 = vmatprep.subr.bf16.mxu1 %v2842_v1 }
 0x5ef   :  { %2513 = vmatpush3.bf16.msra.mxu1 %v2730_v47 }
 0x5f0   :  { %2514 = vmatprep.subr.bf16.mxu1 %v2842_v1 }
 0x5f3   :  { %2515 = vmatpush3.bf16.msra.mxu1 %v2731_v48 }
 0x5f4   :  { %2516 = vmatprep.subr.bf16.mxu1 %v2842_v1 }
 0x5f7   :  { %2517 = vmatpush3.bf16.msra.mxu1 %v2732_v49 }
 0x5f8   :  { %2518 = vmatprep.subr.bf16.mxu1 %v2842_v1 }
 0x5fb   :  { %2519 = vmatpush3.bf16.msra.mxu1 %v2733_v50 }
 0x5fc   :  { %2520 = vmatprep.subr.bf16.mxu1 %v2842_v1 }
 0x5ff   :  { %2521 = vmatpush3.bf16.msra.mxu1 %v2734_v51 }
 0x600   :  { %2522 = vmatprep.subr.bf16.mxu1 %v2842_v1 }
 0x603   :  { %2523 = vmatpush3.bf16.msra.mxu1 %v2735_v52  ;;  %v2753_v52 = vld [vmem:[%s3615_s2 + $0x30] sm:$0xff]  }
 0x604   :  { %2548 = vmatprep.subr.bf16.mxu1 %v2842_v1 }
 0x66f   :  { %v1978_v34 = vpop.xlane.xlu1 %1977 }
 0x670   :  { %v2010_v35 = vadd.f32 %v3070_v63, %v1978_v34  ;;  %v2745_v34 = vld [vmem:[%s3615_s2 + $0x30] sm:$0xff]  }
 0x672   :  { %2026 = vst [vmem:[#allocation3 + $0x30] sm:$0xff] %v2010_v35  ;;  %v2746_v35 = vld [vmem:[%s3615_s2 + $0x28] sm:$0xff]  }
 0x6a6   :  { %v1045_v38 = vpop.f32.mrf.mxu1 }
 0x6a7   :  { %v1051_v39 = vadd.f32 %v1045_v38, %v158_v37  ;;  %v2748_v37 = vld [vmem:[%s3615_s2 + $0x18] sm:$0xff]   ;;  %v2749_v38 = vld [vmem:[%s3615_s2 + $0x10] sm:$0xff]  }
 0x6a8   :  { %v2486_v40 = vpop.f32.mrf.mxu1 }
 0x6a9   :  { %2798 = vtanh.f32 %v1051_v39  ;;  %v2750_v39 = vld [vmem:[%s3615_s2 + $0x8] sm:$0xff]   ;;  %v2751_v40 = vld [vmem:[%s3615_s2] sm:$0xff]  }
 0x6aa   :  { %v1048_v41 = vpop.f32.mrf.mxu1 }
 0x6ac   :  { %v2487_v42 = vpop.f32.mrf.mxu1 }
 0x6b6   :  { %v2799_v43 = vpop.eup %2798 }
 0x6b7   :  { %v1956_v44 = vmul.f32 %v2799_v43, %v2994_v36  ;;  %v1055_v45 = vpack.c.bf16 %v2799_v43, %v2799_v43  ;;  %v138_v43 = vmul.f32 %v2982_v26, %v3061_v60  ;;  %v2752_v60 = vld [vmem:[%s3615_s2 + $0x38] sm:$0xff]  }
 0x6b9   :  { %1979 = vadd.xlane.f32.xlu0 %v1956_v44  ;;  %2505 = vmatmul.mubr.bf16.vlgmr.msra.gmra.mxu0 %v1055_v45  ;;  %v161_v44 = vadd.f32 %v2988_v29, %v138_v43  ;;  %v2774_v43 = vld [vmem:[%s3615_s2 + $0x8] sm:$0xff]  }
 0x6ba   :  { %2544 = vmatprep.mubr.msk.bf16.mxu0 %vm2843_vm0, %v2842_v1  ;;  %2529 = vmatpush3.bf16.msra.mxu0 %v2736_v59 }
 0x6bb   :  { %2530 = vmatprep.subr.bf16.mxu0 %v2842_v1 }
 0x6be   :  { %2531 = vmatpush3.bf16.msra.mxu0 %v2737_v8 }
 0x6bf   :  { %2532 = vmatprep.subr.bf16.mxu0 %v2842_v1 }
 0x6c2   :  { %2533 = vmatpush3.bf16.msra.mxu0 %v2738_v9 }
 0x6c3   :  { %2534 = vmatprep.subr.bf16.mxu0 %v2842_v1 }
 0x6c6   :  { %2535 = vmatpush3.bf16.msra.mxu0 %v2739_v10 }
 0x6c7   :  { %2536 = vmatprep.subr.bf16.mxu0 %v2842_v1 }
 0x6ca   :  { %2537 = vmatpush3.bf16.msra.mxu0 %v2740_v11 }
 0x6cb   :  { %2538 = vmatprep.subr.bf16.mxu0 %v2842_v1 }
 0x6ce   :  { %2539 = vmatpush3.bf16.msra.mxu0 %v2741_v12 }
 0x6cf   :  { %2540 = vmatprep.subr.bf16.mxu0 %v2842_v1 }
 0x6d2   :  { %2541 = vmatpush3.bf16.msra.mxu0 %v2742_v13  ;;  %v2764_v13 = vld [vmem:[%s3615_s2 + $0x18] sm:$0xff]  }
 0x6d3   :  { %2542 = vmatprep.subr.bf16.mxu0 %v2842_v1 }
 0x6d6   :  { %2543 = vmatpush3.bf16.msra.mxu0 %v2743_v14  ;;  %v2765_v14 = vld [vmem:[%s3615_s2 + $0x10] sm:$0xff]  }
 0x6d7   :  { %2568 = vmatprep.subr.bf16.mxu0 %v2842_v1 }
 0x742   :  { %v1980_v53 = vpop.xlane.xlu0 %1979 }
 0x743   :  { %v2011_v54 = vadd.f32 %v3070_v63, %v1980_v53  ;;  %v2754_v53 = vld [vmem:[%s3615_s2 + $0x28] sm:$0xff]  }
 0x745   :  { %2027 = vst [vmem:[#allocation3 + $0x38] sm:$0xff] %v2011_v54  ;;  %v2755_v54 = vld [vmem:[%s3615_s2 + $0x20] sm:$0xff]  }
 0x779   :  { %v1154_v56 = vpop.f32.mrf.mxu0 }
 0x77a   :  { %v1160_v0 = vadd.f32 %v1154_v56, %v159_v23  ;;  %v2757_v23 = vld [vmem:[%s3615_s2 + $0x10] sm:$0xff]   ;;  %v2758_v56 = vld [vmem:[%s3615_s2 + $0x8] sm:$0xff]  }
 0x77b   :  { %v2506_v2 = vpop.f32.mrf.mxu0 }
 0x77c   :  { %2800 = vtanh.f32 %v1160_v0  ;;  %v2759_v0 = vld [vmem:[%s3615_s2] sm:$0xff]  }
 0x77d   :  { %v1157_v3 = vpop.f32.mrf.mxu0 }
 0x77f   :  { %v2507_v4 = vpop.f32.mrf.mxu0 }
 0x780   :  { %v139_v4 = vmul.f32 %v2982_v26, %v3116_v27  ;;  %v2760_v26 = vld [vmem:[%s3615_s2 + $0x38] sm:$0xff]   ;;  %v2763_v27 = vld [vmem:[%s3615_s2 + $0x20] sm:$0xff]  }
 0x789   :  { %v2801_v5 = vpop.eup %2800 }
 0x78a   :  { %v1957_v6 = vmul.f32 %v2801_v5, %v2994_v36  ;;  %v1164_v7 = vpack.c.bf16 %v2801_v5, %v2801_v5  ;;  %v162_v5 = vadd.f32 %v2988_v29, %v139_v4  ;;  %v2761_v29 = vld [vmem:[%s3615_s2 + $0x30] sm:$0xff]  }
 0x78c   :  { %1981 = vadd.xlane.f32.xlu1 %v1957_v6  ;;  %2525 = vmatmul.mubr.bf16.vlgmr.msra.gmra.mxu1 %v1164_v7 }
 0x78d   :  { %2564 = vmatprep.mubr.msk.bf16.mxu1 %vm2843_vm0, %v2842_v1  ;;  %2549 = vmatpush3.bf16.msra.mxu1 %v2744_v25 }
 0x78e   :  { %2550 = vmatprep.subr.bf16.mxu1 %v2842_v1 }
 0x791   :  { %2551 = vmatpush3.bf16.msra.mxu1 %v2745_v34 }
 0x792   :  { %2552 = vmatprep.subr.bf16.mxu1 %v2842_v1 }
 0x795   :  { %2553 = vmatpush3.bf16.msra.mxu1 %v2746_v35  ;;  %v3527_v35 = vld [vmem:[%s3617_s4] ss:$0 sm:$0xff] }
 0x796   :  { %2554 = vmatprep.subr.bf16.mxu1 %v2842_v1 }
 0x799   :  { %2555 = vmatpush3.bf16.msra.mxu1 %v2747_v57 }
 0x79a   :  { %2556 = vmatprep.subr.bf16.mxu1 %v2842_v1 }
 0x79d   :  { %2557 = vmatpush3.bf16.msra.mxu1 %v2748_v37  ;;  %v2768_v37 = vld [vmem:[%s3615_s2 + $0x38] sm:$0xff]  }
 0x79e   :  { %2558 = vmatprep.subr.bf16.mxu1 %v2842_v1 }
 0x7a1   :  { %2559 = vmatpush3.bf16.msra.mxu1 %v2749_v38  ;;  %v2769_v38 = vld [vmem:[%s3615_s2 + $0x30] sm:$0xff]  }
 0x7a2   :  { %2560 = vmatprep.subr.bf16.mxu1 %v2842_v1 }
 0x7a5   :  { %2561 = vmatpush3.bf16.msra.mxu1 %v2750_v39  ;;  %v2770_v39 = vld [vmem:[%s3615_s2 + $0x28] sm:$0xff]  }
 0x7a6   :  { %2562 = vmatprep.subr.bf16.mxu1 %v2842_v1 }
 0x7a9   :  { %2563 = vmatpush3.bf16.msra.mxu1 %v2751_v40  ;;  %v2771_v40 = vld [vmem:[%s3615_s2 + $0x20] sm:$0xff]  }
 0x7aa   :  { %2588 = vmatprep.subr.bf16.mxu1 %v2842_v1 }
 0x815   :  { %v1982_v15 = vpop.xlane.xlu1 %1981 }
 0x816   :  { %v2012_v16 = vadd.f32 %v3070_v63, %v1982_v15  ;;  %v2766_v15 = vld [vmem:[%s3615_s2 + $0x8] sm:$0xff]  }
 0x818   :  { %2028 = vst [vmem:[#allocation3 + $0x40] sm:$0xff] %v2012_v16  ;;  %v2767_v16 = vld [vmem:[%s3615_s2] sm:$0xff]  }
 0x84c   :  { %v1263_v58 = vpop.f32.mrf.mxu1 }
 0x84d   :  { %v1269_v19 = vadd.f32 %v1263_v58, %v160_v18  ;;  %v3514_v58 = vld [vmem:[%s3614_s1] ss:$0 sm:$0xff] }
 0x84e   :  { %v2526_v20 = vpop.f32.mrf.mxu1 }
 0x84f   :  { %2802 = vtanh.f32 %v1269_v19  ;;  %v140_v19 = vmul.f32 %v3514_v58, %v3063_v61  ;;  %v3521_v20 = vld [vmem:[%s3616_s3] ss:$0 sm:$0xff] }
 0x850   :  { %v1266_v21 = vpop.f32.mrf.mxu1 }
 0x851   :  { %v163_v21 = vadd.f32 %v3521_v20, %v140_v19 }
 0x852   :  { %v2527_v22 = vpop.f32.mrf.mxu1 }
 0x85c   :  { %v2803_v31 = vpop.eup %2802 }
 0x85d   :  { %v1958_v32 = vmul.f32 %v2803_v31, %v2994_v36  ;;  %v1273_v33 = vpack.c.bf16 %v2803_v31, %v2803_v31 }
 0x85f   :  { %1983 = vadd.xlane.f32.xlu0 %v1958_v32  ;;  %2545 = vmatmul.mubr.bf16.vlgmr.msra.gmra.mxu0 %v1273_v33 }
 0x860   :  { %2584 = vmatprep.mubr.msk.bf16.mxu0 %vm2843_vm0, %v2842_v1  ;;  %2569 = vmatpush3.bf16.msra.mxu0 %v2752_v60 }
 0x861   :  { %2570 = vmatprep.subr.bf16.mxu0 %v2842_v1 }
 0x864   :  { %2571 = vmatpush3.bf16.msra.mxu0 %v2753_v52 }
 0x865   :  { %2572 = vmatprep.subr.bf16.mxu0 %v2842_v1 }
 0x868   :  { %2573 = vmatpush3.bf16.msra.mxu0 %v2754_v53 }
 0x869   :  { %2574 = vmatprep.subr.bf16.mxu0 %v2842_v1 }
 0x86c   :  { %2575 = vmatpush3.bf16.msra.mxu0 %v2755_v54 }
 0x86d   :  { %2576 = vmatprep.subr.bf16.mxu0 %v2842_v1 }
 0x870   :  { %2577 = vmatpush3.bf16.msra.mxu0 %v2756_v55  ;;  %v2778_v55 = vld [vmem:[%s3615_s2 + $0x28] sm:$0xff]  }
 0x871   :  { %2578 = vmatprep.subr.bf16.mxu0 %v2842_v1 }
 0x874   :  { %2579 = vmatpush3.bf16.msra.mxu0 %v2757_v23  ;;  %v2779_v23 = vld [vmem:[%s3615_s2 + $0x20] sm:$0xff]  }
 0x875   :  { %2580 = vmatprep.subr.bf16.mxu0 %v2842_v1 }
 0x878   :  { %2581 = vmatpush3.bf16.msra.mxu0 %v2758_v56  ;;  %v2780_v56 = vld [vmem:[%s3615_s2 + $0x18] sm:$0xff]  }
 0x879   :  { %2582 = vmatprep.subr.bf16.mxu0 %v2842_v1 }
 0x87c   :  { %2583 = vmatpush3.bf16.msra.mxu0 %v2759_v0  ;;  %v2781_v0 = vld [vmem:[%s3615_s2 + $0x10] sm:$0xff]  }
 0x87d   :  { %2608 = vmatprep.subr.bf16.mxu0 %v2842_v1 }
 0x8e8   :  { %v1984_v41 = vpop.xlane.xlu0 %1983 }
 0x8e9   :  { %v2013_v42 = vadd.f32 %v3070_v63, %v1984_v41  ;;  %v2772_v41 = vld [vmem:[%s3615_s2 + $0x18] sm:$0xff]  }
 0x8eb   :  { %2029 = vst [vmem:[#allocation3 + $0x48] sm:$0xff] %v2013_v42  ;;  %v2773_v42 = vld [vmem:[%s3615_s2 + $0x10] sm:$0xff]  }
 0x91f   :  { %v1372_v45 = vpop.f32.mrf.mxu0 }
 0x920   :  { %v1378_v24 = vadd.f32 %v1372_v45, %v161_v44  ;;  %v2775_v44 = vld [vmem:[%s3615_s2] sm:$0xff]  }
 0x921   :  { %v2546_v46 = vpop.f32.mrf.mxu0 }
 0x922   :  { %2804 = vtanh.f32 %v1378_v24  ;;  %v141_v46 = vmul.f32 %v3514_v58, %v3118_v28  ;;  %v2777_v28 = vld [vmem:[%s3615_s2 + $0x30] sm:$0xff]  }
 0x923   :  { %v1375_v47 = vpop.f32.mrf.mxu0 }
 0x924   :  { %v164_v47 = vadd.f32 %v3521_v20, %v141_v46 }
 0x925   :  { %v2547_v48 = vpop.f32.mrf.mxu0 }
 0x92f   :  { %v2805_v49 = vpop.eup %2804 }
 0x930   :  { %v1959_v50 = vmul.f32 %v2805_v49, %v2994_v36  ;;  %v1382_v51 = vpack.c.bf16 %v2805_v49, %v2805_v49 }
 0x932   :  { %1985 = vadd.xlane.f32.xlu1 %v1959_v50  ;;  %2565 = vmatmul.mubr.bf16.vlgmr.msra.gmra.mxu1 %v1382_v51 }
 0x933   :  { %2604 = vmatprep.mubr.msk.bf16.mxu1 %vm2843_vm0, %v2842_v1  ;;  %2589 = vmatpush3.bf16.msra.mxu1 %v2760_v26 }
 0x934   :  { %2590 = vmatprep.subr.bf16.mxu1 %v2842_v1 }
 0x937   :  { %2591 = vmatpush3.bf16.msra.mxu1 %v2761_v29 }
 0x938   :  { %2592 = vmatprep.subr.bf16.mxu1 %v2842_v1 }
 0x9bb   :  { %v1986_v2 = vpop.xlane.xlu1 %1985 }
 0x9bc   :  { %v2014_v3 = vadd.f32 %v3070_v63, %v1986_v2  ;;  %v2782_v2 = vld [vmem:[%s3615_s2 + $0x8] sm:$0xff]  }
 0x9be   :  { %2030 = vst [vmem:[#allocation3 + $0x50] sm:$0xff] %v2014_v3  ;;  %v2783_v3 = vld [vmem:[%s3615_s2] sm:$0xff]  }
 0x9f2   :  { %v1481_v6 = vpop.f32.mrf.mxu1 }
 0x9f3   :  { %v1487_v7 = vadd.f32 %v1481_v6, %v162_v5  ;;  %v2819_v5 = vld [vmem:[%s3618_s5] ss:$0 sm:$0xff] }
 0x9f4   :  { %v2566_v59 = vpop.f32.mrf.mxu1 }
 0x9f5   :  { %2806 = vtanh.f32 %v1487_v7  ;;  %v142_v7 = vmul.f32 %v3514_v58, %v3065_v62  ;;  %v143_v62 = vmul.f32 %v3514_v58, %v3120_v30 }
 0x9f6   :  { %v1484_v8 = vpop.f32.mrf.mxu1 }
 0x9f7   :  { %v165_v59 = vadd.f32 %v3521_v20, %v142_v7 }
 0x9f8   :  { %v2567_v9 = vpop.f32.mrf.mxu1 }
 0xa02   :  { %v2807_v10 = vpop.eup %2806 }
 0xa03   :  { %v1960_v11 = vmul.f32 %v2807_v10, %v2994_v36  ;;  %v1491_v12 = vpack.c.bf16 %v2807_v10, %v2807_v10  ;;  %v2762_v36 = vld [vmem:[%s3615_s2 + $0x28] sm:$0xff]  }
 0xa04   :  { %2593 = vmatpush3.bf16.msra.mxu1 %v2762_v36 }
 0xa05   :  { %1987 = vadd.xlane.f32.xlu0 %v1960_v11  ;;  %2585 = vmatmul.mubr.bf16.vlgmr.msra.gmra.mxu0 %v1491_v12 }
 0xa06   :  { %2624 = vmatprep.mubr.msk.bf16.mxu0 %vm2843_vm0, %v2842_v1  ;;  %2594 = vmatprep.subr.bf16.mxu1 %v2842_v1 }
 0xa07   :  { %2609 = vmatpush3.bf16.msra.mxu0 %v2768_v37 }
 0xa08   :  { %2595 = vmatpush3.bf16.msra.mxu1 %v2763_v27  ;;  %2610 = vmatprep.subr.bf16.mxu0 %v2842_v1 }
 0xa09   :  { %2596 = vmatprep.subr.bf16.mxu1 %v2842_v1 }
 0xa0b   :  { %2611 = vmatpush3.bf16.msra.mxu0 %v2769_v38 }
 0xa0c   :  { %2597 = vmatpush3.bf16.msra.mxu1 %v2764_v13  ;;  %2612 = vmatprep.subr.bf16.mxu0 %v2842_v1  ;;  %v166_v13 = vadd.f32 %v3521_v20, %v143_v62 }
 0xa0d   :  { %2598 = vmatprep.subr.bf16.mxu1 %v2842_v1 }
 0xa0f   :  { %2613 = vmatpush3.bf16.msra.mxu0 %v2770_v39 }
 0xa10   :  { %2599 = vmatpush3.bf16.msra.mxu1 %v2765_v14  ;;  %2614 = vmatprep.subr.bf16.mxu0 %v2842_v1 }
 0xa11   :  { %2600 = vmatprep.subr.bf16.mxu1 %v2842_v1 }
 0xa13   :  { %2615 = vmatpush3.bf16.msra.mxu0 %v2771_v40 }
 0xa14   :  { %2601 = vmatpush3.bf16.msra.mxu1 %v2766_v15  ;;  %2616 = vmatprep.subr.bf16.mxu0 %v2842_v1 }
 0xa15   :  { %2602 = vmatprep.subr.bf16.mxu1 %v2842_v1 }
 0xa17   :  { %2617 = vmatpush3.bf16.msra.mxu0 %v2772_v41 }
 0xa18   :  { %2603 = vmatpush3.bf16.msra.mxu1 %v2767_v16  ;;  %2618 = vmatprep.subr.bf16.mxu0 %v2842_v1 }
 0xa19   :  { %2628 = vmatprep.subr.bf16.mxu1 %v2842_v1 }
 0xa1b   :  { %2619 = vmatpush3.bf16.msra.mxu0 %v2773_v42 }
 0xa1c   :  { %2620 = vmatprep.subr.bf16.mxu0 %v2842_v1 }
 0xa1f   :  { %2621 = vmatpush3.bf16.msra.mxu0 %v2774_v43 }
 0xa20   :  { %2622 = vmatprep.subr.bf16.mxu0 %v2842_v1 }
 0xa23   :  { %2623 = vmatpush3.bf16.msra.mxu0 %v2775_v44 }
 0xa8e   :  { %v1988_v17 = vpop.xlane.xlu0 %1987 }
 0xa8f   :  { %v2015_v18 = vadd.f32 %v3070_v63, %v1988_v17 }
 0xa91   :  { %2031 = vst [vmem:[#allocation3 + $0x58] sm:$0xff] %v2015_v18 }
 0xac5   :  { %v1590_v22 = vpop.f32.mrf.mxu0 }
 0xac6   :  { %v1596_v31 = vadd.f32 %v1590_v22, %v163_v21 }
 0xac7   :  { %v2586_v32 = vpop.f32.mrf.mxu0 }
 0xac8   :  { %2808 = vtanh.f32 %v1596_v31 }
 0xac9   :  { %v1593_v33 = vpop.f32.mrf.mxu0 }
 0xacb   :  { %v2587_v25 = vpop.f32.mrf.mxu0 }
 0xad5   :  { %v2809_v34 = vpop.eup %2808 }
 0xad6   :  { %v1961_v61 = vmul.f32 %v3527_v35, %v2809_v34  ;;  %v1600_v57 = vpack.c.bf16 %v2809_v34, %v2809_v34 }
 0xad8   :  { %1989 = vadd.xlane.f32.xlu1 %v1961_v61  ;;  %2605 = vmatmul.mubr.bf16.vlgmr.msra.gmra.mxu1 %v1600_v57 }
 0xad9   :  { %2644 = vmatprep.mubr.msk.bf16.mxu1 %vm2843_vm0, %v2842_v1 }
 0xb61   :  { %v1990_v45 = vpop.xlane.xlu1 %1989 }
 0xb62   :  { %v2016_v24 = vadd.f32 %v3070_v63, %v1990_v45  ;;  %v2776_v63 = vld [vmem:[%s3615_s2 + $0x38] sm:$0xff]   ;;  %s2845_s2 = smov [#allocation3]  }
 0xb63   :  { %2629 = vmatpush3.bf16.msra.mxu1 %v2776_v63  ;;  %s2041_s5 = sshll.u32 %s2845_s2, 4  ;;  %s2042_s5 = int_to_ptr.vmem [resolvable:$true] %s2041_s5 }
 0xb64   :  { %2032 = vst [vmem:[#allocation3 + $0x60] sm:$0xff] %v2016_v24  ;;  %2630 = vmatprep.subr.bf16.mxu1 %v2842_v1  ;;  %s2820_s22 = scalar_lea.vmem %s2042_s5, 2048  ;;  %p2825_p1 = scmp.lt.s32.totalorder %s2042_s5, %s2042_s5 }
 0xb65   :  { %p2821_p0 = scmp.ne.s32.totalorder %s2042_s5, %s2820_s22  ;;  %p2826_p2 = scmp.lt.s32.totalorder %s2820_s22, %s2820_s22 }
 0xb67   :  { %2631 = vmatpush3.bf16.msra.mxu1 %v2777_v28  ;;  %p2827_p3 = por %p2826_p2, %p2825_p1 }
 0xb68   :  { %2632 = vmatprep.subr.bf16.mxu1 %v2842_v1 }
 0xb69   :  { %p2828_p4 = pnand %p2827_p3, %p2821_p0 }
 0xb6b   :  { %2633 = vmatpush3.bf16.msra.mxu1 %v2778_v55 }
 0xb6c   :  { %2634 = vmatprep.subr.bf16.mxu1 %v2842_v1 }
 0xb6f   :  { %2635 = vmatpush3.bf16.msra.mxu1 %v2779_v23 }
 0xb70   :  { %2636 = vmatprep.subr.bf16.mxu1 %v2842_v1 }
 0xb73   :  { %2637 = vmatpush3.bf16.msra.mxu1 %v2780_v56 }
 0xb74   :  { %2638 = vmatprep.subr.bf16.mxu1 %v2842_v1 }
 0xb77   :  { %2639 = vmatpush3.bf16.msra.mxu1 %v2781_v0 }
 0xb78   :  { %2640 = vmatprep.subr.bf16.mxu1 %v2842_v1 }
 0xb7b   :  { %2641 = vmatpush3.bf16.msra.mxu1 %v2782_v2 }
 0xb7c   :  { %2642 = vmatprep.subr.bf16.mxu1 %v2842_v1 }
 0xb7f   :  { %2643 = vmatpush3.bf16.msra.mxu1 %v2783_v3 }
 0xb98   :  { %v1699_v48 = vpop.f32.mrf.mxu1 }
 0xb99   :  { %v1705_v49 = vadd.f32 %v1699_v48, %v164_v47 }
 0xb9a   :  { %v2606_v50 = vpop.f32.mrf.mxu1 }
 0xb9b   :  { %2810 = vtanh.f32 %v1705_v49 }
 0xb9c   :  { %v1702_v51 = vpop.f32.mrf.mxu1 }
 0xb9e   :  { %v2607_v60 = vpop.f32.mrf.mxu1 }
 0xba8   :  { %v2811_v52 = vpop.eup %2810 }
 0xba9   :  { %v1962_v53 = vmul.f32 %v3527_v35, %v2811_v52  ;;  %v1709_v54 = vpack.c.bf16 %v2811_v52, %v2811_v52 }
 0xbab   :  { %1991 = vadd.xlane.f32.xlu0 %v1962_v53  ;;  %2625 = vmatmul.mubr.bf16.vlgmr.msra.gmra.mxu0 %v1709_v54 }
 0xc34   :  { %v1992_v4 = vpop.xlane.xlu0 %1991 }
 0xc35   :  { %v2017_v6 = vadd.f32 %v2819_v5, %v1992_v4 }
 0xc37   :  { %2033 = vst [vmem:[#allocation3 + $0x68] sm:$0xff] %v2017_v6 }
 0xc6b   :  { %v1808_v8 = vpop.f32.mrf.mxu0 }
 0xc6c   :  { %v1814_v9 = vadd.f32 %v1808_v8, %v165_v59 }
 0xc6d   :  { %v2626_v10 = vpop.f32.mrf.mxu0 }
 0xc6e   :  { %2812 = vtanh.f32 %v1814_v9 }
 0xc6f   :  { %v1811_v11 = vpop.f32.mrf.mxu0 }
 0xc71   :  { %v2627_v12 = vpop.f32.mrf.mxu0 }
 0xc7b   :  { %v2813_v1 = vpop.eup %2812 }
 0xc7c   :  { %v1963_v26 = vmul.f32 %v3527_v35, %v2813_v1  ;;  %v1818_v29 = vpack.c.bf16 %v2813_v1, %v2813_v1 }
 0xc7e   :  { %1993 = vadd.xlane.f32.xlu1 %v1963_v26  ;;  %2645 = vmatmul.mubr.bf16.vlgmr.msra.gmra.mxu1 %v1818_v29 }
 0xd07   :  { %v1994_v36 = vpop.xlane.xlu1 %1993 }
 0xd08   :  { %v2018_v27 = vadd.f32 %v2819_v5, %v1994_v36 }
 0xd0a   :  { %2034 = vst [vmem:[#allocation3 + $0x70] sm:$0xff] %v2018_v27 }
 0xd3e   :  { %v1917_v14 = vpop.f32.mrf.mxu1 }
 0xd3f   :  { %v1923_v15 = vadd.f32 %v1917_v14, %v166_v13 }
 0xd40   :  { %v2646_v16 = vpop.f32.mrf.mxu1 }
 0xd41   :  { %2814 = vtanh.f32 %v1923_v15 }
 0xd42   :  { %v1920_v17 = vpop.f32.mrf.mxu1 }
 0xd44   :  { %v2647_v18 = vpop.f32.mrf.mxu1 }
 0xd4e   :  { %v2815_v19 = vpop.eup %2814 }
 0xd4f   :  { %v1964_v21 = vmul.f32 %v3527_v35, %v2815_v19 }
 0xd51   :  { %1995 = vadd.xlane.f32.xlu0 %v1964_v21 }
 0xdda   :  { %v1996_v22 = vpop.xlane.xlu0 %1995 }
 0xddb   :  { %v2019_v31 = vadd.f32 %v2819_v5, %v1996_v22 }
 0xddd   :  { %2035 = vst [vmem:[#allocation3 + $0x78] sm:$0xff] %v2019_v31 }
 0xdde   :  { %2831 = shalt.err (!%p2828_p4)
}
 0xddf   :  { %s2846_s23 = smov 128   ;;  %s2847_s24 = smov 8  }
 0xde0   :  { %2047 = dma.vmem_to_hbm [thread:$0]  %s2042_s5, 2048, %s3619_s6, [#allocation4], %s2846_s23, %s2846_s23, %s2847_s24  }
 0xde1   :  { %2840 = dma.done.wait [#allocation4], 2048  }
 0xde2   :  { %2841 = vsyncadd [#allocation4], 4294965248 }
 0xde3   :  { %2051 = vsyncpa [#allocation4], 1 }

</bundles_post_ra>
